<compile_context>
chip_gen: v7x
topology: tpu7x:2x2x1
jax: 0.10.0
libtpu: 0.0.40
codegen_flags: <defaults>
</compile_context>

<pallas_src>
import jax
import jax.numpy as jnp
from jax.experimental import pallas as pl
from jax.experimental.pallas import tpu as pltpu


def _dwconv1_kernel(x_ref, w_ref, s_ref, b_ref, o_ref):
    """Fused per-sample layer_norm + grouped depthwise 3x3 conv.

    x_ref : (1, H+2, W+2, 2D)  zero-padded NHWC sample, channels interleaved
    w_ref : (9, 2D)            taps, w[kh*3+kw, 2d+j] = torch_w[d, j, kh, kw]
    s_ref : (2D, D)            0/1 matrix summing channel pairs (2d, 2d+1)
    b_ref : (1, D)             conv bias
    o_ref : (1, H, W, D)
    """
    _, hp2, wp2, c2 = x_ref.shape
    H, W = hp2 - 2, wp2 - 2
    D = o_ref.shape[-1]

    x = x_ref[...]                                   # (1, H+2, W+2, 2D)

    # ---- F.layer_norm over all (C, H, W) elements of the sample (no affine).
    # Pad zeros contribute 0 to the sums, so these are the interior statistics.
    count = jnp.float32(c2 * H * W)
    mean = jnp.sum(x) / count
    row = jax.lax.broadcasted_iota(jnp.int32, x.shape, 1)
    col = jax.lax.broadcasted_iota(jnp.int32, x.shape, 2)
    interior = (row >= 1) & (row <= H) & (col >= 1) & (col <= W)
    centered = jnp.where(interior, x - mean, 0.0)    # border stays exactly 0
    var = jnp.sum(centered * centered) / count
    xn = centered * jax.lax.rsqrt(var + 1e-5)        # normalized, zero border

    # ---- 3x3 taps: 9 VPU FMAs over the full interleaved 2D lane dimension.
    w = w_ref[...]                                   # (9, 2D)
    acc = jnp.zeros((1, H, W, c2), jnp.float32)
    for kh in range(3):
        for kw in range(3):
            k = kh * 3 + kw
            tap = w[k:k + 1, :].reshape(1, 1, 1, c2)
            acc = acc + xn[:, kh:kh + H, kw:kw + W, :] * tap

    # ---- grouped reduction out[:, d] = acc[:, 2d] + acc[:, 2d+1] (+ bias),
    # as one small matmul against a constant 0/1 matrix (idle MXU slot).
    out = jnp.dot(acc.reshape(H * W, c2), s_ref[...],
                  preferred_element_type=jnp.float32) + b_ref[...]
    o_ref[...] = out.reshape(1, H, W, D)


def dwconv1_forward(x_seq, H, W, conv_w, conv_b):
    """DWConv1 forward.

    x_seq  : (B, N, 2D) float32, N = H*W
    conv_w : (D, 2, 3, 3) float32 (PyTorch grouped-conv layout)
    conv_b : (D,) float32
    returns (B, N, D) float32
    """
    B, N, C2 = x_seq.shape
    D = C2 // 2
    assert N == H * W and conv_w.shape == (D, 2, 3, 3)

    # NCHW view of the sequence == NHWC with channels in the lane dim.
    x_img = x_seq.reshape(B, H, W, C2)
    x_pad = jnp.pad(x_img, ((0, 0), (1, 1), (1, 1), (0, 0)))

    # (D, 2, 3, 3) -> (kh, kw, d, j) -> (9, 2D): lane 2d+j holds torch_w[d, j].
    w_il = jnp.transpose(conv_w, (2, 3, 0, 1)).reshape(9, C2).astype(jnp.float32)
    # 0/1 pair-sum selection matrix (2D, D).
    sel = (jnp.arange(C2)[:, None] // 2 == jnp.arange(D)[None, :]).astype(jnp.float32)

    out = pl.pallas_call(
        _dwconv1_kernel,
        out_shape=jax.ShapeDtypeStruct((B, H, W, D), jnp.float32),
        grid=(B,),
        in_specs=[
            pl.BlockSpec((1, H + 2, W + 2, C2), lambda b: (b, 0, 0, 0)),
            pl.BlockSpec((9, C2), lambda b: (0, 0)),
            pl.BlockSpec((C2, D), lambda b: (0, 0)),
            pl.BlockSpec((1, D), lambda b: (0, 0)),
        ],
        out_specs=pl.BlockSpec((1, H, W, D), lambda b: (b, 0, 0, 0)),
        compiler_params=pltpu.CompilerParams(
            dimension_semantics=("parallel",)),
    )(x_pad, w_il, sel, conv_b.reshape(1, D).astype(jnp.float32))

    return out.reshape(B, N, D)


def dwconv1_reference(x_seq, H, W, conv_w, conv_b):
    """Pure-JAX reference mirroring the PyTorch module exactly (NCHW path)."""
    B, N, C2 = x_seq.shape
    D = C2 // 2
    x = jnp.transpose(x_seq, (0, 2, 1)).reshape(B, C2, H, W)
    mean = jnp.mean(x, axis=(1, 2, 3), keepdims=True)
    var = jnp.mean(jnp.square(x - mean), axis=(1, 2, 3), keepdims=True)
    xn = (x - mean) * jax.lax.rsqrt(var + 1e-5)
    xp = jnp.pad(xn, ((0, 0), (0, 0), (1, 1), (1, 1)))
    y = jnp.zeros((B, D, H, W), jnp.float32)
    for j in range(2):
        for kh in range(3):
            for kw in range(3):
                y = y + (xp[:, j::2, kh:kh + H, kw:kw + W]
                         * conv_w[None, :, j, kh, kw, None, None])
    y = y + conv_b.reshape(1, D, 1, 1)
    return jnp.transpose(y.reshape(B, D, H * W), (0, 2, 1))


if __name__ == "__main__":
    B, dim, H, W = 2, 32, 16, 16
    C2, N = 2 * dim, H * W

    key = jax.random.PRNGKey(0)
    kx, kw, kb = jax.random.split(key, 3)
    x = jax.random.normal(kx, (B, N, C2), jnp.float32)
    conv_w = jax.random.normal(kw, (dim, 2, 3, 3), jnp.float32) * (2.0 / 18.0) ** 0.5
    conv_b = 0.1 * jax.random.normal(kb, (dim,), jnp.float32)

    fwd = jax.jit(dwconv1_forward, static_argnums=(1, 2))
    out = fwd(x, H, W, conv_w, conv_b)
    jax.block_until_ready(out)
    assert out.shape == (B, N, dim)

    ref = dwconv1_reference(x, H, W, conv_w, conv_b)
    max_err = float(jnp.max(jnp.abs(out - ref)))
    assert jnp.allclose(out, ref, rtol=2e-2, atol=2e-2), max_err

    print("KERNEL_OK")
</pallas_src>

<mosaic_0001>
module attributes {stable_mosaic.version = 11 : i64} {
  func.func @_dwconv1_kernel(%arg0: i32, %arg1: memref<1x18x18x64xf32, #tpu.memory_space<vmem>>, %arg2: memref<9x64xf32, #tpu.memory_space<vmem>>, %arg3: memref<64x32xf32, #tpu.memory_space<vmem>>, %arg4: memref<1x32xf32, #tpu.memory_space<vmem>>, %arg5: memref<1x16x16x32xf32, #tpu.memory_space<vmem>>) attributes {dimension_semantics = [#tpu.dimension_semantics<parallel>], iteration_bounds = array<i64: 2>, scalar_prefetch = 0 : i64, scratch_operands = 0 : i64, tpu.core_type = #tpu.core_type<tc>, window_params = [{transform_indices = @transform_0, window_bounds = array<i64: 1, 18, 18, 64>}, {pipeline_mode = #tpu.pipeline_mode<synchronous>, transform_indices = @transform_1, window_bounds = array<i64: 9, 64>}, {pipeline_mode = #tpu.pipeline_mode<synchronous>, transform_indices = @transform_2, window_bounds = array<i64: 64, 32>}, {pipeline_mode = #tpu.pipeline_mode<synchronous>, transform_indices = @transform_3, window_bounds = array<i64: 1, 32>}, {transform_indices = @transform_4, window_bounds = array<i64: 1, 16, 16, 32>}]} {
    %c0 = arith.constant 0 : index
    %c0_0 = arith.constant 0 : index
    %c0_1 = arith.constant 0 : index
    %c0_2 = arith.constant 0 : index
    %0 = vector.load %arg1[%c0, %c0_0, %c0_1, %c0_2] : memref<1x18x18x64xf32, #tpu.memory_space<vmem>>, vector<1x18x18x64xf32>
    %1 = vector.shape_cast %0 : vector<1x18x18x64xf32> to vector<1x1x18x18x64xf32>
    %cst = arith.constant dense<0.000000e+00> : vector<1xf32>
    %2 = vector.multi_reduction <add>, %1, %cst [1, 2, 3, 4] : vector<1x1x18x18x64xf32> to vector<1xf32>
    %3 = vector.shape_cast %2 : vector<1xf32> to vector<1x1x1x1x1xf32>
    %4 = vector.extract %3[0, 0, 0, 0, 0] : f32 from vector<1x1x1x1x1xf32>
    %cst_3 = arith.constant 1.638400e+04 : f32
    %5 = arith.divf %4, %cst_3 : f32
    %6 = tpu.iota {dimensions = array<i32: 1>} : vector<1x18x18x64xi32>
    %7 = tpu.iota {dimensions = array<i32: 2>} : vector<1x18x18x64xi32>
    %c1_i32 = arith.constant 1 : i32
    %8 = vector.broadcast %c1_i32 : i32 to vector<1x18x18x64xi32>
    %9 = arith.cmpi sge, %6, %8 : vector<1x18x18x64xi32>
    %c16_i32 = arith.constant 16 : i32
    %10 = vector.broadcast %c16_i32 : i32 to vector<1x18x18x64xi32>
    %11 = arith.cmpi sle, %6, %10 : vector<1x18x18x64xi32>
    %12 = arith.andi %9, %11 : vector<1x18x18x64xi1>
    %c1_i32_4 = arith.constant 1 : i32
    %13 = vector.broadcast %c1_i32_4 : i32 to vector<1x18x18x64xi32>
    %14 = arith.cmpi sge, %7, %13 : vector<1x18x18x64xi32>
    %15 = arith.andi %12, %14 : vector<1x18x18x64xi1>
    %c16_i32_5 = arith.constant 16 : i32
    %16 = vector.broadcast %c16_i32_5 : i32 to vector<1x18x18x64xi32>
    %17 = arith.cmpi sle, %7, %16 : vector<1x18x18x64xi32>
    %18 = arith.andi %15, %17 : vector<1x18x18x64xi1>
    %19 = vector.broadcast %5 : f32 to vector<1x18x18x64xf32>
    %20 = arith.subf %0, %19 : vector<1x18x18x64xf32>
    %cst_6 = arith.constant 0.000000e+00 : f32
    %21 = vector.broadcast %cst_6 : f32 to vector<1x18x18x64xf32>
    %22 = arith.select %18, %20, %21 : vector<1x18x18x64xi1>, vector<1x18x18x64xf32>
    %23 = arith.mulf %22, %22 : vector<1x18x18x64xf32>
    %24 = vector.shape_cast %23 : vector<1x18x18x64xf32> to vector<1x1x18x18x64xf32>
    %cst_7 = arith.constant dense<0.000000e+00> : vector<1xf32>
    %25 = vector.multi_reduction <add>, %24, %cst_7 [1, 2, 3, 4] : vector<1x1x18x18x64xf32> to vector<1xf32>
    %26 = vector.shape_cast %25 : vector<1xf32> to vector<1x1x1x1x1xf32>
    %27 = vector.extract %26[0, 0, 0, 0, 0] : f32 from vector<1x1x1x1x1xf32>
    %cst_8 = arith.constant 1.638400e+04 : f32
    %28 = arith.divf %27, %cst_8 : f32
    %cst_9 = arith.constant 9.99999974E-6 : f32
    %29 = arith.addf %28, %cst_9 : f32
    %30 = math.rsqrt %29 : f32
    %31 = vector.broadcast %30 : f32 to vector<1x18x18x64xf32>
    %32 = arith.mulf %22, %31 : vector<1x18x18x64xf32>
    %c0_10 = arith.constant 0 : index
    %c0_11 = arith.constant 0 : index
    %33 = vector.load %arg2[%c0_10, %c0_11] : memref<9x64xf32, #tpu.memory_space<vmem>>, vector<9x64xf32>
    %cst_12 = arith.constant 0.000000e+00 : f32
    %34 = vector.broadcast %cst_12 : f32 to vector<1x16x16x64xf32>
    %35 = vector.extract_strided_slice %33 {offsets = [0, 0], sizes = [1, 64], strides = [1, 1]} : vector<9x64xf32> to vector<1x64xf32>
    %36 = vector.shape_cast %35 : vector<1x64xf32> to vector<1x1x1x64xf32>
    %37 = vector.extract_strided_slice %32 {offsets = [0, 0, 0, 0], sizes = [1, 16, 16, 64], strides = [1, 1, 1, 1]} : vector<1x18x18x64xf32> to vector<1x16x16x64xf32>
    %38 = vector.broadcast %36 : vector<1x1x1x64xf32> to vector<1x16x16x64xf32>
    %39 = arith.mulf %37, %38 : vector<1x16x16x64xf32>
    %40 = arith.addf %34, %39 : vector<1x16x16x64xf32>
    %41 = vector.extract_strided_slice %33 {offsets = [1, 0], sizes = [1, 64], strides = [1, 1]} : vector<9x64xf32> to vector<1x64xf32>
    %42 = vector.shape_cast %41 : vector<1x64xf32> to vector<1x1x1x64xf32>
    %43 = vector.extract_strided_slice %32 {offsets = [0, 0, 1, 0], sizes = [1, 16, 16, 64], strides = [1, 1, 1, 1]} : vector<1x18x18x64xf32> to vector<1x16x16x64xf32>
    %44 = vector.broadcast %42 : vector<1x1x1x64xf32> to vector<1x16x16x64xf32>
    %45 = arith.mulf %43, %44 : vector<1x16x16x64xf32>
    %46 = arith.addf %40, %45 : vector<1x16x16x64xf32>
    %47 = vector.extract_strided_slice %33 {offsets = [2, 0], sizes = [1, 64], strides = [1, 1]} : vector<9x64xf32> to vector<1x64xf32>
    %48 = vector.shape_cast %47 : vector<1x64xf32> to vector<1x1x1x64xf32>
    %49 = vector.extract_strided_slice %32 {offsets = [0, 0, 2, 0], sizes = [1, 16, 16, 64], strides = [1, 1, 1, 1]} : vector<1x18x18x64xf32> to vector<1x16x16x64xf32>
    %50 = vector.broadcast %48 : vector<1x1x1x64xf32> to vector<1x16x16x64xf32>
    %51 = arith.mulf %49, %50 : vector<1x16x16x64xf32>
    %52 = arith.addf %46, %51 : vector<1x16x16x64xf32>
    %53 = vector.extract_strided_slice %33 {offsets = [3, 0], sizes = [1, 64], strides = [1, 1]} : vector<9x64xf32> to vector<1x64xf32>
    %54 = vector.shape_cast %53 : vector<1x64xf32> to vector<1x1x1x64xf32>
    %55 = vector.extract_strided_slice %32 {offsets = [0, 1, 0, 0], sizes = [1, 16, 16, 64], strides = [1, 1, 1, 1]} : vector<1x18x18x64xf32> to vector<1x16x16x64xf32>
    %56 = vector.broadcast %54 : vector<1x1x1x64xf32> to vector<1x16x16x64xf32>
    %57 = arith.mulf %55, %56 : vector<1x16x16x64xf32>
    %58 = arith.addf %52, %57 : vector<1x16x16x64xf32>
    %59 = vector.extract_strided_slice %33 {offsets = [4, 0], sizes = [1, 64], strides = [1, 1]} : vector<9x64xf32> to vector<1x64xf32>
    %60 = vector.shape_cast %59 : vector<1x64xf32> to vector<1x1x1x64xf32>
    %61 = vector.extract_strided_slice %32 {offsets = [0, 1, 1, 0], sizes = [1, 16, 16, 64], strides = [1, 1, 1, 1]} : vector<1x18x18x64xf32> to vector<1x16x16x64xf32>
    %62 = vector.broadcast %60 : vector<1x1x1x64xf32> to vector<1x16x16x64xf32>
    %63 = arith.mulf %61, %62 : vector<1x16x16x64xf32>
    %64 = arith.addf %58, %63 : vector<1x16x16x64xf32>
    %65 = vector.extract_strided_slice %33 {offsets = [5, 0], sizes = [1, 64], strides = [1, 1]} : vector<9x64xf32> to vector<1x64xf32>
    %66 = vector.shape_cast %65 : vector<1x64xf32> to vector<1x1x1x64xf32>
    %67 = vector.extract_strided_slice %32 {offsets = [0, 1, 2, 0], sizes = [1, 16, 16, 64], strides = [1, 1, 1, 1]} : vector<1x18x18x64xf32> to vector<1x16x16x64xf32>
    %68 = vector.broadcast %66 : vector<1x1x1x64xf32> to vector<1x16x16x64xf32>
    %69 = arith.mulf %67, %68 : vector<1x16x16x64xf32>
    %70 = arith.addf %64, %69 : vector<1x16x16x64xf32>
    %71 = vector.extract_strided_slice %33 {offsets = [6, 0], sizes = [1, 64], strides = [1, 1]} : vector<9x64xf32> to vector<1x64xf32>
    %72 = vector.shape_cast %71 : vector<1x64xf32> to vector<1x1x1x64xf32>
    %73 = vector.extract_strided_slice %32 {offsets = [0, 2, 0, 0], sizes = [1, 16, 16, 64], strides = [1, 1, 1, 1]} : vector<1x18x18x64xf32> to vector<1x16x16x64xf32>
    %74 = vector.broadcast %72 : vector<1x1x1x64xf32> to vector<1x16x16x64xf32>
    %75 = arith.mulf %73, %74 : vector<1x16x16x64xf32>
    %76 = arith.addf %70, %75 : vector<1x16x16x64xf32>
    %77 = vector.extract_strided_slice %33 {offsets = [7, 0], sizes = [1, 64], strides = [1, 1]} : vector<9x64xf32> to vector<1x64xf32>
    %78 = vector.shape_cast %77 : vector<1x64xf32> to vector<1x1x1x64xf32>
    %79 = vector.extract_strided_slice %32 {offsets = [0, 2, 1, 0], sizes = [1, 16, 16, 64], strides = [1, 1, 1, 1]} : vector<1x18x18x64xf32> to vector<1x16x16x64xf32>
    %80 = vector.broadcast %78 : vector<1x1x1x64xf32> to vector<1x16x16x64xf32>
    %81 = arith.mulf %79, %80 : vector<1x16x16x64xf32>
    %82 = arith.addf %76, %81 : vector<1x16x16x64xf32>
    %83 = vector.extract_strided_slice %33 {offsets = [8, 0], sizes = [1, 64], strides = [1, 1]} : vector<9x64xf32> to vector<1x64xf32>
    %84 = vector.shape_cast %83 : vector<1x64xf32> to vector<1x1x1x64xf32>
    %85 = vector.extract_strided_slice %32 {offsets = [0, 2, 2, 0], sizes = [1, 16, 16, 64], strides = [1, 1, 1, 1]} : vector<1x18x18x64xf32> to vector<1x16x16x64xf32>
    %86 = vector.broadcast %84 : vector<1x1x1x64xf32> to vector<1x16x16x64xf32>
    %87 = arith.mulf %85, %86 : vector<1x16x16x64xf32>
    %88 = arith.addf %82, %87 : vector<1x16x16x64xf32>
    %89 = vector.shape_cast %88 : vector<1x16x16x64xf32> to vector<256x64xf32>
    %c0_13 = arith.constant 0 : index
    %c0_14 = arith.constant 0 : index
    %90 = vector.load %arg3[%c0_13, %c0_14] : memref<64x32xf32, #tpu.memory_space<vmem>>, vector<64x32xf32>
    %cst_15 = arith.constant dense<0.000000e+00> : vector<256x32xf32>
    %91 = tpu.matmul %89, %90, %cst_15 {dimension_numbers = #tpu.dot_dimension_numbers<[1], [0], [0], [1], [0, 0, 1, 1], [], []>} : vector<256x64xf32>, vector<64x32xf32>, vector<256x32xf32> -> vector<256x32xf32>
    %c0_16 = arith.constant 0 : index
    %c0_17 = arith.constant 0 : index
    %92 = vector.load %arg4[%c0_16, %c0_17] : memref<1x32xf32, #tpu.memory_space<vmem>>, vector<1x32xf32>
    %93 = vector.broadcast %92 : vector<1x32xf32> to vector<256x32xf32>
    %94 = arith.addf %91, %93 : vector<256x32xf32>
    %95 = vector.shape_cast %94 : vector<256x32xf32> to vector<1x16x16x32xf32>
    %c0_18 = arith.constant 0 : index
    %c0_19 = arith.constant 0 : index
    %c0_20 = arith.constant 0 : index
    %c0_21 = arith.constant 0 : index
    %96 = vector.load %arg5[%c0_18, %c0_19, %c0_20, %c0_21] : memref<1x16x16x32xf32, #tpu.memory_space<vmem>>, vector<1x16x16x32xf32>
    tpu.vector_store %arg5[%c0_18, %c0_19, %c0_20, %c0_21], %95 {strides = array<i32>} : memref<1x16x16x32xf32, #tpu.memory_space<vmem>>, vector<1x16x16x32xf32>,
    return
  }
  func.func @transform_0(%arg0: i32) -> (i32, i32, i32, i32) {
    %c0_i32 = arith.constant 0 : i32
    %c0_i32_0 = arith.constant 0 : i32
    %c0_i32_1 = arith.constant 0 : i32
    %c0_i32_2 = arith.constant 0 : i32
    return %arg0, %c0_i32, %c0_i32_0, %c0_i32_1 : i32, i32, i32, i32
  }
  func.func @transform_1(%arg0: i32) -> (i32, i32) {
    %c0_i32 = arith.constant 0 : i32
    %c0_i32_0 = arith.constant 0 : i32
    %c0_i32_1 = arith.constant 0 : i32
    return %c0_i32, %c0_i32_0 : i32, i32
  }
  func.func @transform_2(%arg0: i32) -> (i32, i32) {
    %c0_i32 = arith.constant 0 : i32
    %c0_i32_0 = arith.constant 0 : i32
    %c0_i32_1 = arith.constant 0 : i32
    return %c0_i32, %c0_i32_0 : i32, i32
  }
  func.func @transform_3(%arg0: i32) -> (i32, i32) {
    %c0_i32 = arith.constant 0 : i32
    %c0_i32_0 = arith.constant 0 : i32
    %c0_i32_1 = arith.constant 0 : i32
    return %c0_i32, %c0_i32_0 : i32, i32
  }
  func.func @transform_4(%arg0: i32) -> (i32, i32, i32, i32) {
    %c0_i32 = arith.constant 0 : i32
    %c0_i32_0 = arith.constant 0 : i32
    %c0_i32_1 = arith.constant 0 : i32
    %c0_i32_2 = arith.constant 0 : i32
    return %arg0, %c0_i32, %c0_i32_0, %c0_i32_1 : i32, i32, i32, i32
  }
}

</mosaic_0001>

<bundles_post_ra>
// kernel: dwconv1_forward.1
= control target key start
LH: loop header
LB: loop body
LE: loop exit
PB: predicated region body
PF: predicated region fallthrough
CT: control target
= control target key end

     0   :  { %s3057_s15 = smov 0   ;;  %s5693_s0 = inlined_call_operand.vmem [shape: f32[2,18,18,64], index: 0, kind: input, shape index: {}]   ;;  %s5694_s1 = inlined_call_operand.vmem [shape: f32[9,64], index: 1, kind: input, shape index: {}]   ;;  %s5695_s2 = inlined_call_operand.vmem [shape: f32[64,32], index: 2, kind: input, shape index: {}]   ;;  %s5696_s3 = inlined_call_operand.vmem [shape: f32[1,32], index: 3, kind: input, shape index: {}]   ;;  %s5697_s4 = inlined_call_operand.vmem [shape: f32[2,16,16,32], index: 4, kind: output, shape index: {}]  }
   0x1 LB: > { %s2832_s16 = sadd.s32 4294967295, %s3030_s15   ;;  %p2836_p0 = scmp.ge.s32.totalorder %s3030_s15, 1  ;;  %s3030_s15 = sphi %s3057_s15, %s14_s15  }
   0x2   : > { %p162_p1 = scmp.lt.s32.totalorder %s3030_s15, 3 }
   0x4   : > { %p163_p2 = pnand %p2836_p0, %p162_p1 }
   0x6   : > { %166 = sbr.rel (%p163_p2) target bundleno = 1235 (0x4d3), region = 36 }
   0xd   : > { %p188_p3 = scmp.lt.s32.totalorder %s2832_s16, 1  ;;  %vm252_vm0 = vcmask 523264   ;;  %vm256_vm1 = vcmask 517120   ;;  %vm906_vm4 = vcmask 1046528   ;;  %vm1151_vm5 = vcmask 1045504  }
   0xe   : > { %vm2744_vm6 = vcmask 261120  }
   0xf   : > { %s5896_s16 = smov (!%p188_p3, %s2832_s16), 1 }
  0x10   : > { %s3005_s17 = smul.u32 432, %s5896_s16  ;;  %s2876_s27 = sshll.u32 %s5896_s16, 8 }
  0x11   : > { %s5564_s5 = scalar_lea.vmem %s5697_s4, %s2876_s27 }
  0x12   : > { %s3071_s20 = scalar_lea.vmem %s5693_s0, %s3005_s17 }
  0x13   : > { %v198_v0 = vld [vmem:[%s3071_s20] sm:$0xff]  ;;  %v199_v1 = vld [vmem:[%s3071_s20 + $0x8] sm:$0xff]  ;;  %v200_v2 = vld [vmem:[%s3071_s20 + $0x10] sm:$0x3] }
  0x14   : > { %v3077_v3 = vld [vmem:[%s3071_s20 + $0x18] sm:$0xff]  ;;  %v253_v4 = vsel %vm252_vm0, %v198_v0, 0.0  ;;  %v254_v5 = vsel %vm252_vm0, %v199_v1, 0.0  ;;  %v3082_v6 = vld [vmem:[%s3071_s20 + $0x20] sm:$0xff]  ;;  %v257_v8 = vsel %vm256_vm1, %v200_v2, 0.0  ;;  %v3093_v13 = vld [vmem:[%s3071_s20 + $0x30] sm:$0xff] }
  0x15   : > { %v255_v7 = vadd.f32 %v254_v5, %v253_v4  ;;  %v259_v9 = vsel %vm252_vm0, %v3077_v3, 0.0  ;;  %v3088_v10 = vld [vmem:[%s3071_s20 + $0x28] sm:$0x3]  ;;  %v261_v12 = vsel %vm252_vm0, %v3082_v6, 0.0  ;;  %v3098_v16 = vld [vmem:[%s3071_s20 + $0x38] sm:$0xff]  ;;  %v265_v18 = vsel %vm252_vm0, %v3093_v13, 0.0 }
  0x16   : > { %v263_v15 = vsel %vm256_vm1, %v3088_v10, 0.0  ;;  %v3103_v19 = vld [vmem:[%s3071_s20 + $0x40] sm:$0x3]  ;;  %v267_v21 = vsel %vm252_vm0, %v3098_v16, 0.0  ;;  %v3108_v22 = vld [vmem:[%s3071_s20 + $0x48] sm:$0xff]  ;;  %v3113_v25 = vld [vmem:[%s3071_s20 + $0x50] sm:$0xff] }
  0x17   : > { %v258_v11 = vadd.f32 %v257_v8, %v255_v7  ;;  %v269_v24 = vsel %vm256_vm1, %v3103_v19, 0.0  ;;  %v271_v27 = vsel %vm252_vm0, %v3108_v22, 0.0  ;;  %v3118_v28 = vld [vmem:[%s3071_s20 + $0x58] sm:$0x3]  ;;  %v273_v30 = vsel %vm252_vm0, %v3113_v25, 0.0  ;;  %v3123_v31 = vld [vmem:[%s3071_s20 + $0x60] sm:$0xff] }
  0x18   : > { %v275_v33 = vsel %vm256_vm1, %v3118_v28, 0.0  ;;  %v3128_v34 = vld [vmem:[%s3071_s20 + $0x68] sm:$0xff]  ;;  %v277_v36 = vsel %vm252_vm0, %v3123_v31, 0.0  ;;  %v3133_v37 = vld [vmem:[%s3071_s20 + $0x70] sm:$0x3]  ;;  %v3138_v40 = vld [vmem:[%s3071_s20 + $0x78] sm:$0xff] }
  0x19   : > { %v260_v14 = vadd.f32 %v259_v9, %v258_v11  ;;  %v279_v39 = vsel %vm252_vm0, %v3128_v34, 0.0  ;;  %v281_v42 = vsel %vm256_vm1, %v3133_v37, 0.0  ;;  %v3143_v43 = vld [vmem:[%s3071_s20 + $0x80] sm:$0xff]  ;;  %v283_v45 = vsel %vm252_vm0, %v3138_v40, 0.0  ;;  %v3148_v46 = vld [vmem:[%s3071_s20 + $0x88] sm:$0x3] }
  0x1a   : > { %v285_v48 = vsel %vm252_vm0, %v3143_v43, 0.0  ;;  %v3153_v49 = vld [vmem:[%s3071_s20 + $0x90] sm:$0xff]  ;;  %v287_v51 = vsel %vm256_vm1, %v3148_v46, 0.0  ;;  %v3158_v52 = vld [vmem:[%s3071_s20 + $0x98] sm:$0xff]  ;;  %v3163_v55 = vld [vmem:[%s3071_s20 + $0xa0] sm:$0x3] }
  0x1b   : > { %v262_v17 = vadd.f32 %v261_v12, %v260_v14  ;;  %v289_v54 = vsel %vm252_vm0, %v3153_v49, 0.0  ;;  %v291_v57 = vsel %vm252_vm0, %v3158_v52, 0.0  ;;  %v3168_v58 = vld [vmem:[%s3071_s20 + $0xa8] sm:$0xff]  ;;  %v293_v60 = vsel %vm256_vm1, %v3163_v55, 0.0  ;;  %v3173_v61 = vld [vmem:[%s3071_s20 + $0xb0] sm:$0xff]  ;;  %v3183_v4 = vld [vmem:[%s3071_s20 + $0xc0] sm:$0xff] }
  0x1c   : > { %v295_v63 = vsel %vm252_vm0, %v3168_v58, 0.0  ;;  %v3178_v0 = vld [vmem:[%s3071_s20 + $0xb8] sm:$0x3]  ;;  %v297_v2 = vsel %vm252_vm0, %v3173_v61, 0.0  ;;  %v3188_v8 = vld [vmem:[%s3071_s20 + $0xc8] sm:$0xff]  ;;  %v301_v11 = vsel %vm252_vm0, %v3183_v4, 0.0 }
  0x1d   : > { %v264_v20 = vadd.f32 %v263_v15, %v262_v17  ;;  %v299_v7 = vsel %vm256_vm1, %v3178_v0, 0.0  ;;  %v3193_v12 = vld [vmem:[%s3071_s20 + $0xd0] sm:$0x3]  ;;  %v303_v15 = vsel %vm252_vm0, %v3188_v8, 0.0  ;;  %v3198_v17 = vld [vmem:[%s3071_s20 + $0xd8] sm:$0xff] }
  0x1f   : > { %v266_v23 = vadd.f32 %v265_v18, %v264_v20  ;;  %v305_v20 = vsel %vm256_vm1, %v3193_v12, 0.0 }
  0x21   : > { %v268_v26 = vadd.f32 %v267_v21, %v266_v23  ;;  %v3203_v21 = vld [vmem:[%s3071_s20 + $0xe0] sm:$0xff] }
  0x23   : > { %v270_v29 = vadd.f32 %v269_v24, %v268_v26  ;;  %v307_v24 = vsel %vm252_vm0, %v3198_v17, 0.0  ;;  %v3208_v26 = vld [vmem:[%s3071_s20 + $0xe8] sm:$0x3] }
  0x25   : > { %v272_v32 = vadd.f32 %v271_v27, %v270_v29  ;;  %v309_v29 = vsel %vm252_vm0, %v3203_v21, 0.0 }
  0x27   : > { %v274_v35 = vadd.f32 %v273_v30, %v272_v32  ;;  %v3213_v30 = vld [vmem:[%s3071_s20 + $0xf0] sm:$0xff] }
  0x29   : > { %v276_v38 = vadd.f32 %v275_v33, %v274_v35  ;;  %v311_v33 = vsel %vm256_vm1, %v3208_v26, 0.0  ;;  %v3218_v35 = vld [vmem:[%s3071_s20 + $0xf8] sm:$0xff] }
  0x2b   : > { %v278_v41 = vadd.f32 %v277_v36, %v276_v38  ;;  %v313_v38 = vsel %vm252_vm0, %v3213_v30, 0.0 }
  0x2d   : > { %v280_v44 = vadd.f32 %v279_v39, %v278_v41  ;;  %v3223_v39 = vld [vmem:[%s3071_s20 + $0x100] sm:$0x3] }
  0x2f   : > { %v282_v47 = vadd.f32 %v281_v42, %v280_v44  ;;  %v315_v42 = vsel %vm252_vm0, %v3218_v35, 0.0  ;;  %v3228_v44 = vld [vmem:[%s3071_s20 + $0x108] sm:$0xff] }
  0x31   : > { %v284_v50 = vadd.f32 %v283_v45, %v282_v47  ;;  %v317_v47 = vsel %vm256_vm1, %v3223_v39, 0.0 }
  0x33   : > { %v286_v53 = vadd.f32 %v285_v48, %v284_v50  ;;  %v3233_v48 = vld [vmem:[%s3071_s20 + $0x110] sm:$0xff] }
  0x35   : > { %v288_v56 = vadd.f32 %v287_v51, %v286_v53  ;;  %v319_v51 = vsel %vm252_vm0, %v3228_v44, 0.0  ;;  %v3238_v53 = vld [vmem:[%s3071_s20 + $0x118] sm:$0x3] }
  0x37   : > { %v290_v59 = vadd.f32 %v289_v54, %v288_v56  ;;  %v321_v56 = vsel %vm252_vm0, %v3233_v48, 0.0 }
  0x39   : > { %v292_v62 = vadd.f32 %v291_v57, %v290_v59  ;;  %v3243_v57 = vld [vmem:[%s3071_s20 + $0x120] sm:$0xff] }
  0x3b   : > { %v294_v1 = vadd.f32 %v293_v60, %v292_v62  ;;  %v323_v60 = vsel %vm256_vm1, %v3238_v53, 0.0  ;;  %v3248_v62 = vld [vmem:[%s3071_s20 + $0x128] sm:$0xff] }
  0x3c   : > { %5782 = vst [vmem:[#allocation2_spill] sm:$0xff] %v3248_v62 }
  0x3d   : > { %v296_v5 = vadd.f32 %v295_v63, %v294_v1  ;;  %v325_v1 = vsel %vm252_vm0, %v3243_v57, 0.0 }
  0x3f   : > { %v298_v9 = vadd.f32 %v297_v2, %v296_v5  ;;  %v3253_v2 = vld [vmem:[%s3071_s20 + $0x130] sm:$0x3] }
  0x41   : > { %v300_v14 = vadd.f32 %v299_v7, %v298_v9  ;;  %v327_v7 = vsel %vm252_vm0, %v3248_v62, 0.0  ;;  %v3258_v9 = vld [vmem:[%s3071_s20 + $0x138] sm:$0xff] }
  0x43   : > { %v302_v18 = vadd.f32 %v301_v11, %v300_v14  ;;  %v329_v14 = vsel %vm256_vm1, %v3253_v2, 0.0 }
  0x45   : > { %v304_v23 = vadd.f32 %v303_v15, %v302_v18  ;;  %v3263_v15 = vld [vmem:[%s3071_s20 + $0x140] sm:$0xff] }
  0x46   : > { %5783 = vst [vmem:[#allocation3_spill] sm:$0xff] %v3263_v15 }
  0x47   : > { %v306_v27 = vadd.f32 %v305_v20, %v304_v23  ;;  %v331_v20 = vsel %vm252_vm0, %v3258_v9, 0.0  ;;  %v3268_v23 = vld [vmem:[%s3071_s20 + $0x148] sm:$0x3] }
  0x49   : > { %v308_v32 = vadd.f32 %v307_v24, %v306_v27  ;;  %v333_v27 = vsel %vm252_vm0, %v3263_v15, 0.0 }
  0x4b   : > { %v310_v36 = vadd.f32 %v309_v29, %v308_v32  ;;  %v3273_v29 = vld [vmem:[%s3071_s20 + $0x150] sm:$0xff] }
  0x4d   : > { %v312_v41 = vadd.f32 %v311_v33, %v310_v36  ;;  %v335_v33 = vsel %vm256_vm1, %v3268_v23, 0.0  ;;  %v3278_v36 = vld [vmem:[%s3071_s20 + $0x158] sm:$0xff] }
  0x4e   : > { %5784 = vst [vmem:[#allocation4_spill] sm:$0xff] %v3278_v36 }
  0x4f   : > { %v314_v45 = vadd.f32 %v313_v38, %v312_v41  ;;  %v337_v41 = vsel %vm252_vm0, %v3273_v29, 0.0 }
  0x51   : > { %v316_v50 = vadd.f32 %v315_v42, %v314_v45  ;;  %v3283_v42 = vld [vmem:[%s3071_s20 + $0x160] sm:$0x3] }
  0x53   : > { %v318_v54 = vadd.f32 %v317_v47, %v316_v50  ;;  %v339_v47 = vsel %vm252_vm0, %v3278_v36, 0.0  ;;  %v3288_v50 = vld [vmem:[%s3071_s20 + $0x168] sm:$0xff] }
  0x55   : > { %v320_v59 = vadd.f32 %v319_v51, %v318_v54  ;;  %v341_v54 = vsel %vm256_vm1, %v3283_v42, 0.0 }
  0x57   : > { %v322_v63 = vadd.f32 %v321_v56, %v320_v59  ;;  %v3293_v56 = vld [vmem:[%s3071_s20 + $0x170] sm:$0xff] }
  0x58   : > { %5785 = vst [vmem:[#allocation5_spill] sm:$0xff] %v3293_v56 }
  0x59   : > { %v324_v5 = vadd.f32 %v323_v60, %v322_v63  ;;  %v343_v60 = vsel %vm252_vm0, %v3288_v50, 0.0  ;;  %v245_v63 = vld [vmem:[%s3071_s20 + $0x178] sm:$0x3] }
  0x5b   : > { %v326_v11 = vadd.f32 %v325_v1, %v324_v5  ;;  %v345_v5 = vsel %vm252_vm0, %v3293_v56, 0.0 }
  0x5d   : > { %v328_v18 = vadd.f32 %v327_v7, %v326_v11  ;;  %v246_v7 = vld [vmem:[%s3071_s20 + $0x180] sm:$0xff] }
  0x5f   : > { %v330_v24 = vadd.f32 %v329_v14, %v328_v18  ;;  %v347_v14 = vsel %vm256_vm1, %v245_v63, 0.0  ;;  %v3303_v18 = vld [vmem:[%s3071_s20 + $0x188] sm:$0xff] }
  0x60   : > { %5786 = vst [vmem:[#allocation6_spill] sm:$0xff] %v3303_v18 }
  0x61   : > { %v332_v32 = vadd.f32 %v331_v20, %v330_v24  ;;  %v349_v24 = vsel %vm252_vm0, %v246_v7, 0.0 }
  0x63   : > { %v334_v38 = vadd.f32 %v333_v27, %v332_v32  ;;  %v248_v27 = vld [vmem:[%s3071_s20 + $0x190] sm:$0x3] }
  0x65   : > { %v336_v45 = vadd.f32 %v335_v33, %v334_v38  ;;  %v351_v33 = vsel %vm252_vm0, %v3303_v18, 0.0  ;;  %v249_v38 = vld [vmem:[%s3071_s20 + $0x198] sm:$0xff] }
  0x67   : > { %v338_v51 = vadd.f32 %v337_v41, %v336_v45  ;;  %v353_v45 = vsel %vm256_vm1, %v248_v27, 0.0 }
  0x69   : > { %v340_v59 = vadd.f32 %v339_v47, %v338_v51  ;;  %v250_v47 = vld [vmem:[%s3071_s20 + $0x1a0] sm:$0xff] }
  0x6b   : > { %v342_v1 = vadd.f32 %v341_v54, %v340_v59  ;;  %v355_v54 = vsel %vm252_vm0, %v249_v38, 0.0  ;;  %v251_v59 = vld [vmem:[%s3071_s20 + $0x1a8] sm:$0x3] }
  0x6d   : > { %v344_v11 = vadd.f32 %v343_v60, %v342_v1  ;;  %v357_v1 = vsel %vm252_vm0, %v250_v47, 0.0 }
  0x6f   : > { %v346_v20 = vadd.f32 %v345_v5, %v344_v11  ;;  %v359_v11 = vsel %vm256_vm1, %v251_v59, 0.0 }
  0x71   : > { %v348_v32 = vadd.f32 %v347_v14, %v346_v20 }
  0x73   : > { %v350_v41 = vadd.f32 %v349_v24, %v348_v32 }
  0x75   : > { %v352_v51 = vadd.f32 %v351_v33, %v350_v41  ;;  %v373_v33 = vlaneseq }
  0x77   : > { %v354_v60 = vadd.f32 %v353_v45, %v352_v51  ;;  %v3316_v38 = vshrl.u32 %v373_v33, 7 }
  0x79   : > { %v356_v5 = vadd.f32 %v355_v54, %v354_v60  ;;  %v3319_v41 = vadd.s32 16, %v3316_v38  ;;  %vm377_vm2 = vcmp.ge.s32.totalorder %v3316_v38, 1 }
  0x7b   : > { %v358_v56 = vadd.f32 %v357_v1, %v356_v5  ;;  %vm388_vm3 = vcmp.le.s32.totalorder %v3319_v41, 16 }
  0x7d   : > { %v360_v14 = vadd.f32 %v359_v11, %v358_v56 }
  0x7f   : > { %361 = vadd.xlane.f32.xlu0 %v360_v14 }
 0x10c   : > { %v362_v20 = vpop.xlane.xlu0 %361 }
 0x10d   : > { %v363_v18 = vrot.slane %v362_v20, 4 }
 0x10f   : > { %v364_v36 = vadd.f32 %v363_v18, %v362_v20 }
 0x111   : > { %v365_v24 = vrot.slane %v364_v36, 2 }
 0x113   : > { %v366_v32 = vadd.f32 %v365_v24, %v364_v36 }
 0x115   : > { %v367_v15 = vrot.slane %v366_v32, 1 }
 0x117   : > { %v368_v62 = vadd.f32 %v367_v15, %v366_v32 }
 0x119   : > { %3006 = vpush %v368_v62 }
 0x14a   : > { %s3007_s21 = spop %3006 }
 0x14b   : > { %s372_s22 = smul.f32 6.1035156e-05, %s3007_s21 }
 0x14d   : > { %v3321_v45 = vstv %s372_s22 }
 0x14e   : > { %v432_v36 = vsub.f32 %v3243_v57, %v3321_v45  ;;  %v434_v62 = vsub.f32 %v3253_v2, %v3321_v45  ;;  %v435_v15 = vsub.f32 %v3258_v9, %v3321_v45  ;;  %v437_v56 = vsub.f32 %v3268_v23, %v3321_v45 }
 0x14f   : > { %v438_v18 = vsub.f32 %v3273_v29, %v3321_v45  ;;  %v440_v47 = vsub.f32 %v3283_v42, %v3321_v45  ;;  %v441_v51 = vsub.f32 %v3288_v50, %v3321_v45  ;;  %v443_v57 = vsub.f32 %v245_v63, %v3321_v45 }
 0x150   : > { %v444_v54 = vsub.f32 %v246_v7, %v3321_v45  ;;  %v446_v2 = vsub.f32 %v248_v27, %v3321_v45  ;;  %v3344_v9 = vsel %vm377_vm2, %v432_v36, 0.0  ;;  %v3348_v23 = vsel %vm388_vm3, %v434_v62, 0.0 }
 0x151   : > { %v3352_v29 = vsel %vm377_vm2, %v435_v15, 0.0  ;;  %v3356_v42 = vsel %vm388_vm3, %v437_v56, 0.0  ;;  %v3360_v50 = vsel %vm377_vm2, %v438_v18, 0.0  ;;  %v3364_v63 = vsel %vm388_vm3, %v440_v47, 0.0 }
 0x152   : > { %v3368_v7 = vsel %vm377_vm2, %v441_v51, 0.0  ;;  %v3372_v27 = vsel %vm388_vm3, %v443_v57, 0.0  ;;  %v3376_v59 = vsel %vm377_vm2, %v444_v54, 0.0  ;;  %v3380_v60 = vsel %vm388_vm3, %v446_v2, 0.0 }
 0x153   : > { %v399_v1 = vsub.f32 %v3077_v3, %v3321_v45  ;;  %v401_v5 = vsub.f32 %v3088_v10, %v3321_v45  ;;  %v3388_v11 = vsub.f32 %v3082_v6, %v3321_v45  ;;  %v402_v14 = vsub.f32 %v3093_v13, %v3321_v45 }
 0x154   : > { %v404_v6 = vsub.f32 %v3103_v19, %v3321_v45  ;;  %v3412_v32 = vsub.f32 %v3098_v16, %v3321_v45  ;;  %v405_v36 = vsub.f32 %v3108_v22, %v3321_v45  ;;  %v407_v22 = vsub.f32 %v3118_v28, %v3321_v45 }
 0x155   : > { %v3394_v20 = vsel %vm377_vm2, %v399_v1, 0.0  ;;  %v3398_v24 = vsel %vm388_vm3, %v401_v5, 0.0  ;;  %v508_v10 = vmul.f32 %v3388_v11, %v3388_v11  ;;  %v3408_v13 = vsel %vm377_vm2, %v402_v14, 0.0 }
 0x156   : > { %v507_v3 = vmul.f32 %v3394_v20, %v3394_v20  ;;  %v509_v33 = vmul.f32 %v3398_v24, %v3398_v24  ;;  %v510_v62 = vmul.f32 %v3408_v13, %v3408_v13  ;;  %v3424_v56 = vsel %vm388_vm3, %v404_v6, 0.0 }
 0x157   : > { %v565_v19 = vsel %vm252_vm0, %v508_v10, 0.0  ;;  %v511_v16 = vmul.f32 %v3412_v32, %v3412_v32  ;;  %v3433_v51 = vsel %vm377_vm2, %v405_v36, 0.0  ;;  %v3437_v54 = vsub.f32 %v3113_v25, %v3321_v45 }
 0x158   : > { %v563_v15 = vsel %vm252_vm0, %v507_v3, 0.0  ;;  %v567_v47 = vsel %vm256_vm1, %v509_v33, 0.0  ;;  %v512_v2 = vmul.f32 %v3424_v56, %v3424_v56  ;;  %v569_v1 = vsel %vm252_vm0, %v510_v62, 0.0 }
 0x159   : > { %v566_v18 = vadd.f32 %v565_v19, %v563_v15  ;;  %v408_v5 = vsub.f32 %v3123_v31, %v3321_v45  ;;  %v513_v28 = vmul.f32 %v3433_v51, %v3433_v51  ;;  %v571_v3 = vsel %vm252_vm0, %v511_v16, 0.0 }
 0x15a   : > { %v3449_v10 = vsel %vm388_vm3, %v407_v22, 0.0  ;;  %v514_v6 = vmul.f32 %v3437_v54, %v3437_v54  ;;  %v573_v33 = vsel %vm256_vm1, %v512_v2, 0.0  ;;  %v410_v36 = vsub.f32 %v3133_v37, %v3321_v45 }
 0x15b   : > { %v568_v57 = vadd.f32 %v567_v47, %v566_v18  ;;  %v3458_v31 = vsel %vm377_vm2, %v408_v5, 0.0  ;;  %v3462_v15 = vsub.f32 %v3128_v34, %v3321_v45  ;;  %v515_v19 = vmul.f32 %v3449_v10, %v3449_v10 }
 0x15c   : > { %v575_v18 = vsel %vm252_vm0, %v513_v28, 0.0  ;;  %v411_v16 = vsub.f32 %v3138_v40, %v3321_v45  ;;  %v516_v37 = vmul.f32 %v3458_v31, %v3458_v31  ;;  %v577_v22 = vsel %vm252_vm0, %v514_v6, 0.0 }
 0x15d   : > { %v570_v14 = vadd.f32 %v569_v1, %v568_v57  ;;  %v3474_v57 = vsel %vm388_vm3, %v410_v36, 0.0  ;;  %v517_v2 = vmul.f32 %v3462_v15, %v3462_v15  ;;  %v579_v1 = vsel %vm256_vm1, %v515_v19, 0.0 }
 0x15e   : > { %5787 = vst [vmem:[#allocation7_spill] sm:$0xff] %v3474_v57  ;;  %v413_v5 = vsub.f32 %v3148_v46, %v3321_v45  ;;  %v3483_v40 = vsel %vm377_vm2, %v411_v16, 0.0  ;;  %v3487_v28 = vsub.f32 %v3143_v43, %v3321_v45  ;;  %v414_v6 = vsub.f32 %v3153_v49, %v3321_v45 }
 0x15f   : > { %v572_v25 = vadd.f32 %v571_v3, %v570_v14  ;;  %5788 = vst [vmem:[#allocation8_spill] sm:$0xff] %v3483_v40  ;;  %v518_v3 = vmul.f32 %v3474_v57, %v3474_v57  ;;  %v519_v46 = vmul.f32 %v3483_v40, %v3483_v40  ;;  %v583_v36 = vsel %vm252_vm0, %v517_v2, 0.0 }
 0x160   : > { %5789 = vst [vmem:[#allocation9_spill] sm:$0xff] %v3487_v28  ;;  %v520_v19 = vmul.f32 %v3487_v28, %v3487_v28  ;;  %v416_v16 = vsub.f32 %v3163_v55, %v3321_v45  ;;  %v3508_v49 = vsel %vm377_vm2, %v414_v6, 0.0  ;;  %v417_v2 = vsub.f32 %v3168_v58, %v3321_v45 }
 0x161   : > { %v574_v62 = vadd.f32 %v573_v33, %v572_v25  ;;  %v581_v25 = vsel %vm252_vm0, %v516_v37, 0.0  ;;  %5791 = vst [vmem:[#allocation11_spill] sm:$0xff] %v3508_v49  ;;  %v3512_v37 = vsub.f32 %v3158_v52, %v3321_v45  ;;  %v522_v55 = vmul.f32 %v3508_v49, %v3508_v49 }
 0x162   : > { %v419_v6 = vsub.f32 %v3178_v0, %v3321_v45  ;;  %v3533_v58 = vsel %vm377_vm2, %v417_v2, 0.0  ;;  %v422_v2 = vsub.f32 %v3193_v12, %v3321_v45  ;;  %v540_v41 = vmul.f32 %v3344_v9, %v3344_v9 }
 0x163   : > { %v576_v47 = vadd.f32 %v575_v18, %v574_v62  ;;  %v3499_v62 = vsel %vm388_vm3, %v413_v5, 0.0  ;;  %v585_v18 = vsel %vm256_vm1, %v518_v3, 0.0  ;;  %5792 = vst [vmem:[#allocation12_spill] sm:$0xff] %v3512_v37  ;;  %v589_v5 = vsel %vm252_vm0, %v520_v19, 0.0  ;;  %5794 = vst [vmem:[#allocation14_spill] sm:$0xff] %v3533_v58 }
 0x164   : > { %5790 = vst [vmem:[#allocation10_spill] sm:$0xff] %v3499_v62  ;;  %v523_v3 = vmul.f32 %v3512_v37, %v3512_v37  ;;  %v420_v19 = vsub.f32 %v3183_v4, %v3321_v45  ;;  %v525_v0 = vmul.f32 %v3533_v58, %v3533_v58 }
 0x165   : > { %v578_v34 = vadd.f32 %v577_v22, %v576_v47  ;;  %v521_v22 = vmul.f32 %v3499_v62, %v3499_v62 }
 0x166   : > { %v3558_v4 = vsel %vm377_vm2, %v420_v19, 0.0  ;;  %v425_v19 = vsub.f32 %v3208_v26, %v3321_v45 }
 0x167   : > { %v580_v14 = vadd.f32 %v579_v1, %v578_v34  ;;  %v587_v34 = vsel %vm252_vm0, %v519_v46, 0.0  ;;  %v3537_v46 = vsub.f32 %v3173_v61, %v3321_v45  ;;  %v528_v12 = vmul.f32 %v3558_v4, %v3558_v4 }
 0x169   : > { %v582_v33 = vadd.f32 %v581_v25, %v580_v14  ;;  %v3524_v14 = vsel %vm388_vm3, %v416_v16, 0.0  ;;  %v591_v25 = vsel %vm256_vm1, %v521_v22, 0.0  ;;  %5795 = vst [vmem:[#allocation15_spill] sm:$0xff] %v3537_v46  ;;  %v595_v16 = vsel %vm252_vm0, %v523_v3, 0.0 }
 0x16a   : > { %5793 = vst [vmem:[#allocation13_spill] sm:$0xff] %v3524_v14  ;;  %v526_v22 = vmul.f32 %v3537_v46, %v3537_v46  ;;  %v423_v3 = vsub.f32 %v3198_v17, %v3321_v45 }
 0x16b   : > { %v584_v43 = vadd.f32 %v583_v36, %v582_v33  ;;  %v524_v36 = vmul.f32 %v3524_v14, %v3524_v14 }
 0x16c   : > { %v3583_v17 = vsel %vm377_vm2, %v423_v3, 0.0  ;;  %v428_v3 = vsub.f32 %v3223_v39, %v3321_v45 }
 0x16d   : > { %v586_v47 = vadd.f32 %v585_v18, %v584_v43  ;;  %v593_v43 = vsel %vm252_vm0, %v522_v55, 0.0  ;;  %v3562_v55 = vsub.f32 %v3188_v8, %v3321_v45  ;;  %v531_v26 = vmul.f32 %v3583_v17, %v3583_v17 }
 0x16f   : > { %v588_v1 = vadd.f32 %v587_v34, %v586_v47  ;;  %v3549_v47 = vsel %vm388_vm3, %v419_v6, 0.0  ;;  %v597_v34 = vsel %vm256_vm1, %v524_v36, 0.0  ;;  %v601_v6 = vsel %vm252_vm0, %v526_v22, 0.0 }
 0x170   : > { %5796 = vst [vmem:[#allocation16_spill] sm:$0xff] %v3549_v47  ;;  %v529_v36 = vmul.f32 %v3562_v55, %v3562_v55  ;;  %v426_v22 = vsub.f32 %v3213_v30, %v3321_v45 }
 0x171   : > { %v590_v52 = vadd.f32 %v589_v5, %v588_v1  ;;  %v527_v5 = vmul.f32 %v3549_v47, %v3549_v47 }
 0x172   : > { %v3608_v30 = vsel %vm377_vm2, %v426_v22, 0.0  ;;  %v431_v22 = vsub.f32 %v3238_v53, %v3321_v45 }
 0x173   : > { %v592_v33 = vadd.f32 %v591_v25, %v590_v52  ;;  %v599_v52 = vsel %vm252_vm0, %v525_v0, 0.0  ;;  %v3587_v0 = vsub.f32 %v3203_v21, %v3321_v45  ;;  %v534_v39 = vmul.f32 %v3608_v30, %v3608_v30 }
 0x175   : > { %v594_v18 = vadd.f32 %v593_v43, %v592_v33  ;;  %v3574_v33 = vsel %vm388_vm3, %v422_v2, 0.0  ;;  %v603_v43 = vsel %vm256_vm1, %v527_v5, 0.0  ;;  %v607_v2 = vsel %vm252_vm0, %v529_v36, 0.0 }
 0x176   : > { %v532_v5 = vmul.f32 %v3587_v0, %v3587_v0  ;;  %v429_v36 = vsub.f32 %v3228_v44, %v3321_v45 }
 0x177   : > { %v596_v61 = vadd.f32 %v595_v16, %v594_v18  ;;  %v530_v16 = vmul.f32 %v3574_v33, %v3574_v33 }
 0x178   : > { %v3633_v44 = vsel %vm377_vm2, %v429_v36, 0.0  ;;  %v5797_v36 = vld [vmem:[#allocation2_spill] sm:$0xff] }
 0x179   : > { %v598_v1 = vadd.f32 %v597_v34, %v596_v61  ;;  %v605_v61 = vsel %vm252_vm0, %v528_v12, 0.0  ;;  %v3612_v12 = vsub.f32 %v3218_v35, %v3321_v45 }
 0x17b   : > { %v600_v25 = vadd.f32 %v599_v52, %v598_v1  ;;  %v3599_v1 = vsel %vm388_vm3, %v425_v19, 0.0  ;;  %v609_v52 = vsel %vm256_vm1, %v530_v16, 0.0  ;;  %v613_v19 = vsel %vm252_vm0, %v532_v5, 0.0 }
 0x17c   : > { %v535_v16 = vmul.f32 %v3612_v12, %v3612_v12 }
 0x17d   : > { %v602_v8 = vadd.f32 %v601_v6, %v600_v25  ;;  %v533_v6 = vmul.f32 %v3599_v1, %v3599_v1 }
 0x17e   : > { %v619_v53 = vsel %vm252_vm0, %v535_v16, 0.0 }
 0x17f   : > { %v604_v18 = vadd.f32 %v603_v43, %v602_v8  ;;  %v611_v8 = vsel %vm252_vm0, %v531_v26, 0.0  ;;  %v3637_v26 = vsub.f32 %v3233_v48, %v3321_v45 }
 0x181   : > { %v606_v34 = vadd.f32 %v605_v61, %v604_v18  ;;  %v3624_v18 = vsel %vm388_vm3, %v428_v3, 0.0  ;;  %v615_v61 = vsel %vm256_vm1, %v533_v6, 0.0  ;;  %v3647_v3 = vsel %vm388_vm3, %v431_v22, 0.0 }
 0x182   : > { %v538_v48 = vmul.f32 %v3637_v26, %v3637_v26 }
 0x183   : > { %v608_v21 = vadd.f32 %v607_v2, %v606_v34  ;;  %v536_v2 = vmul.f32 %v3624_v18, %v3624_v18 }
 0x184   : > { %v625_v16 = vsel %vm252_vm0, %v538_v48, 0.0  ;;  %v543_v48 = vmul.f32 %v3352_v29, %v3352_v29 }
 0x185   : > { %v610_v25 = vadd.f32 %v609_v52, %v608_v21  ;;  %v617_v21 = vsel %vm252_vm0, %v534_v39, 0.0  ;;  %v537_v52 = vmul.f32 %v3633_v44, %v3633_v44  ;;  %v621_v6 = vsel %vm256_vm1, %v536_v2, 0.0 }
 0x186   : > { %v539_v39 = vmul.f32 %v3647_v3, %v3647_v3 }
 0x187   : > { %v612_v43 = vadd.f32 %v611_v8, %v610_v25 }
 0x189   : > { %v614_v35 = vadd.f32 %v613_v19, %v612_v43  ;;  %v3654_v43 = vsub.f32 %v5797_v36, %v3321_v45  ;;  %v623_v19 = vsel %vm252_vm0, %v537_v52, 0.0  ;;  %v542_v52 = vmul.f32 %v3348_v23, %v3348_v23 }
 0x18b   : > { %v616_v34 = vadd.f32 %v615_v61, %v614_v35  ;;  %v541_v22 = vmul.f32 %v3654_v43, %v3654_v43 }
 0x18d   : > { %v618_v5 = vadd.f32 %v617_v21, %v616_v34  ;;  %v627_v34 = vsel %vm256_vm1, %v539_v39, 0.0  ;;  %v5798_v21 = vld [vmem:[#allocation3_spill] sm:$0xff]  ;;  %v633_v39 = vsel %vm256_vm1, %v542_v52, 0.0 }
 0x18f   : > { %v620_v25 = vadd.f32 %v619_v53, %v618_v5  ;;  %v3667_v5 = vsub.f32 %v5798_v21, %v3321_v45  ;;  %v629_v53 = vsel %vm252_vm0, %v540_v41, 0.0  ;;  %v545_v41 = vmul.f32 %v3356_v42, %v3356_v42 }
 0x191   : > { %v622_v8 = vadd.f32 %v621_v6, %v620_v25  ;;  %v631_v6 = vsel %vm252_vm0, %v541_v22, 0.0  ;;  %v544_v36 = vmul.f32 %v3667_v5, %v3667_v5  ;;  %v546_v22 = vmul.f32 %v3360_v50, %v3360_v50 }
 0x193   : > { %v624_v35 = vadd.f32 %v623_v19, %v622_v8 }
 0x195   : > { %v626_v61 = vadd.f32 %v625_v16, %v624_v35  ;;  %v5799_v35 = vld [vmem:[#allocation4_spill] sm:$0xff] }
 0x196   : > { %v3680_v16 = vsub.f32 %v5799_v35, %v3321_v45 }
 0x197   : > { %v628_v2 = vadd.f32 %v627_v34, %v626_v61  ;;  %v635_v61 = vsel %vm252_vm0, %v543_v48, 0.0  ;;  %v548_v48 = vmul.f32 %v3364_v63, %v3364_v63 }
 0x198   : > { %v547_v52 = vmul.f32 %v3680_v16, %v3680_v16 }
 0x199   : > { %v630_v25 = vadd.f32 %v629_v53, %v628_v2  ;;  %v637_v2 = vsel %vm252_vm0, %v544_v36, 0.0  ;;  %v639_v53 = vsel %vm256_vm1, %v545_v41, 0.0  ;;  %v549_v36 = vmul.f32 %v3368_v7, %v3368_v7 }
 0x19a   : > { %v643_v35 = vsel %vm252_vm0, %v547_v52, 0.0  ;;  %v552_v52 = vmul.f32 %v3376_v59, %v3376_v59 }
 0x19b   : > { %v632_v8 = vadd.f32 %v631_v6, %v630_v25  ;;  %v5800_v6 = vld [vmem:[#allocation5_spill] sm:$0xff] }
 0x19d   : > { %v634_v19 = vadd.f32 %v633_v39, %v632_v8  ;;  %v3693_v8 = vsub.f32 %v5800_v6, %v3321_v45  ;;  %v641_v39 = vsel %vm252_vm0, %v546_v22, 0.0  ;;  %v551_v22 = vmul.f32 %v3372_v27, %v3372_v27 }
 0x19f   : > { %v636_v34 = vadd.f32 %v635_v61, %v634_v19  ;;  %v550_v41 = vmul.f32 %v3693_v8, %v3693_v8 }
 0x1a1   : > { %v638_v21 = vadd.f32 %v637_v2, %v636_v34  ;;  %v645_v34 = vsel %vm256_vm1, %v548_v48, 0.0 }
 0x1a3   : > { %v640_v25 = vadd.f32 %v639_v53, %v638_v21  ;;  %v5801_v21 = vld [vmem:[#allocation6_spill] sm:$0xff] }
 0x1a4   : > { %v3706_v53 = vsub.f32 %v5801_v21, %v3321_v45  ;;  %v554_v45 = vmul.f32 %v3380_v60, %v3380_v60 }
 0x1a5   : > { %v642_v19 = vadd.f32 %v641_v39, %v640_v25  ;;  %v647_v25 = vsel %vm252_vm0, %v549_v36, 0.0  ;;  %v649_v39 = vsel %vm252_vm0, %v550_v41, 0.0 }
 0x1a6   : > { %v553_v48 = vmul.f32 %v3706_v53, %v3706_v53 }
 0x1a7   : > { %v644_v61 = vadd.f32 %v643_v35, %v642_v19  ;;  %v651_v35 = vsel %vm256_vm1, %v551_v22, 0.0 }
 0x1a8   : > { %v655_v36 = vsel %vm252_vm0, %v553_v48, 0.0  ;;  %v2410_v48 = vld [vmem:[%s5695_s2 + $0x10] sm:$0xff] }
 0x1a9   : > { %v646_v2 = vadd.f32 %v645_v34, %v644_v61  ;;  %v653_v34 = vsel %vm252_vm0, %v552_v52, 0.0  ;;  %v2409_v52 = vld [vmem:[%s5695_s2 + $0x8] sm:$0xff] }
 0x1ab   : > { %v648_v6 = vadd.f32 %v647_v25, %v646_v2  ;;  %v657_v25 = vsel %vm256_vm1, %v554_v45, 0.0  ;;  %v2413_v45 = vld [vmem:[%s5695_s2 + $0x28] sm:$0xff] }
 0x1ad   : > { %v650_v19 = vadd.f32 %v649_v39, %v648_v6 }
 0x1af   : > { %v652_v61 = vadd.f32 %v651_v35, %v650_v19  ;;  %v2408_v35 = vld [vmem:[%s5695_s2] sm:$0xff] }
 0x1b1   : > { %v654_v21 = vadd.f32 %v653_v34, %v652_v61  ;;  %v2411_v61 = vld [vmem:[%s5695_s2 + $0x18] sm:$0xff] }
 0x1b3   : > { %v656_v2 = vadd.f32 %v655_v36, %v654_v21  ;;  %v2414_v21 = vld [vmem:[%s5695_s2 + $0x30] sm:$0xff]  ;;  %v2415_v36 = vld [vmem:[%s5695_s2 + $0x38] sm:$0xff] }
 0x1b5   : > { %v658_v47 = vadd.f32 %v657_v25, %v656_v2  ;;  %v2993_v2 = vpack.c.bf16 %v2415_v36, %v2414_v21 }
 0x1b7   : > { %665 = vadd.xlane.f32.xlu0 %v658_v47  ;;  %v2981_v47 = vpack.c.bf16 %v2409_v52, %v2408_v35  ;;  %v736_v35 = vld [vmem:[%s5694_s1] sm:$0xff]  ;;  %v1366_v52 = vsub.s32 4, %v3316_v38 }
 0x1b9   : > { %2982 = vmatprep.subr.bf16.mxu0 %v2981_v47  ;;  %2997 = vmatprep.subr.bf16.mxu1 %v2981_v47  ;;  %v3767_v36 = vrot.slane %v736_v35, %v1366_v52 }
 0x1ba   : > { %2984 = vmatpush3.bf16.msra.mxu0 %v2981_v47  ;;  %3001 = vmatpush3.bf16.msra.mxu1 %v2981_v47  ;;  %v1854_v47 = vsub.s32 6, %v3316_v38 }
 0x244   : > { %v666_v41 = vpop.xlane.xlu0 %665 }
 0x245   : > { %v667_v6 = vrot.slane %v666_v41, 4 }
 0x247   : > { %v668_v39 = vadd.f32 %v667_v6, %v666_v41  ;;  %v740_v6 = vsub.s32 0, %v3316_v38 }
 0x249   : > { %v669_v46 = vrot.slane %v668_v39, 2 }
 0x24b   : > { %v670_v58 = vadd.f32 %v669_v46, %v668_v39  ;;  %v2985_v46 = vpack.c.bf16 %v2411_v61, %v2410_v48  ;;  %v808_v39 = vsub.s32 1, %v3316_v38  ;;  %v1610_v48 = vsub.s32 5, %v3316_v38 }
 0x24c   : > { %v1922_v61 = vsub.s32 7, %v3316_v38 }
 0x24d   : > { %v671_v22 = vrot.slane %v670_v58, 1  ;;  %2986 = vmatprep.subr.bf16.mxu0 %v2985_v46  ;;  %2998 = vmatprep.subr.bf16.mxu1 %v2985_v46 }
 0x24e   : > { %2988 = vmatpush3.bf16.msra.mxu0 %v2985_v46  ;;  %3002 = vmatpush3.bf16.msra.mxu1 %v2985_v46 }
 0x24f   : > { %v672_v19 = vadd.f32 %v671_v22, %v670_v58  ;;  %v2412_v58 = vld [vmem:[%s5695_s2 + $0x20] sm:$0xff]  ;;  %v1053_v22 = vsub.s32 2, %v3316_v38 }
 0x250   : > { %v2989_v34 = vpack.c.bf16 %v2413_v45, %v2412_v58  ;;  %v3759_v58 = vrot.slane %v736_v35, %v740_v6  ;;  %v3761_v45 = vrot.slane %v736_v35, %v808_v39 }
 0x251   : > { %3008 = vpush %v672_v19  ;;  %v1298_v19 = vsub.s32 3, %v3316_v38 }
 0x252   : > { %2990 = vmatprep.subr.bf16.mxu0 %v2989_v34  ;;  %2999 = vmatprep.subr.bf16.mxu1 %v2989_v34 }
 0x253   : > { %2992 = vmatpush3.bf16.msra.mxu0 %v2989_v34  ;;  %3003 = vmatpush3.bf16.msra.mxu1 %v2989_v34  ;;  %v3763_v34 = vrot.slane %v736_v35, %v1053_v22  ;;  %v3765_v21 = vrot.slane %v736_v35, %v1298_v19 }
 0x254   : > { %2994 = vmatprep.subr.bf16.mxu0 %v2993_v2  ;;  %3000 = vmatprep.subr.bf16.mxu1 %v2993_v2 }
 0x257   : > { %2996 = vmatpush3.bf16.msra.mxu0 %v2993_v2  ;;  %3004 = vmatpush3.bf16.msra.mxu1 %v2993_v2  ;;  %v3769_v2 = vrot.slane %v736_v35, %v1610_v48 }
 0x282   : > { %s3009_s13 = spop %3008 }
 0x283   : > { %s676_s14 = smul.f32 6.1035156e-05, %s3009_s13 }
 0x285   : > { %s677_s17 = sadd.f32 1e-05, %s676_s14 }
 0x287   : > { %v678_v25 = vstv %s677_s17 }
 0x288   : > { %3020 = vrsqrt.f32 %v678_v25  ;;  %v3771_v25 = vrot.slane %v736_v35, %v1854_v47 }
 0x292   : > { %v3021_v41 = vpop.eup %3020 }
 0x293   : > { %3010 = vpush %v3021_v41  ;;  %v3773_v41 = vrot.slane %v736_v35, %v1922_v61 }
 0x2c4   : > { %s3011_s20 = spop %3010 }
 0x2c5   : > { %v3757_v46 = vstv %s3011_s20 }
 0x2c6   : > { %v3777_v38 = vmul.f32 %v3757_v46, %v3562_v55  ;;  %v3781_v6 = vmul.f32 %v3757_v46, %v3583_v17  ;;  %v3785_v39 = vmul.f32 %v3757_v46, %v3587_v0  ;;  %v3789_v22 = vmul.f32 %v3757_v46, %v3608_v30 }
 0x2c7   : > { %v3793_v19 = vmul.f32 %v3757_v46, %v3612_v12  ;;  %v3797_v55 = vmul.f32 %v3757_v46, %v3633_v44  ;;  %v3801_v17 = vmul.f32 %v3757_v46, %v3637_v26  ;;  %v3805_v0 = vmul.f32 %v3757_v46, %v3344_v9 }
 0x2c8   : > { %5802 = vst [vmem:[#allocation2_spill] sm:$0xff] %v3777_v38  ;;  %5803 = vst [vmem:[#allocation3_spill] sm:$0xff] %v3781_v6  ;;  %v3809_v30 = vmul.f32 %v3757_v46, %v3654_v43  ;;  %v3813_v12 = vmul.f32 %v3757_v46, %v3348_v23  ;;  %v3817_v44 = vmul.f32 %v3757_v46, %v3352_v29  ;;  %v3832_v23 = vmul.f32 0.0, %v3757_v46 }
 0x2c9   : > { %v3821_v26 = vmul.f32 %v3757_v46, %v3667_v5  ;;  %v3825_v9 = vmul.f32 %v3757_v46, %v3356_v42  ;;  %v3829_v43 = vmul.f32 %v3757_v46, %v3360_v50  ;;  %v3836_v29 = vmul.f32 %v3757_v46, %v3394_v20 }
 0x2ca   : > { %5804 = vst [vmem:[#allocation4_spill] sm:$0xff] %v3809_v30  ;;  %5805 = vst [vmem:[#allocation5_spill] sm:$0xff] %v3813_v12  ;;  %v3840_v5 = vmul.f32 %v3757_v46, %v3680_v16  ;;  %v3844_v35 = vmul.f32 %v3757_v46, %v3364_v63  ;;  %v3848_v42 = vmul.f32 %v3757_v46, %v3368_v7 }
 0x2cb   : > { %5806 = vst [vmem:[#allocation6_spill] sm:$0xff] %v3817_v44  ;;  %5807 = vst [vmem:[#allocation17_spill] sm:$0xff] %v3821_v26  ;;  %v3852_v50 = vmul.f32 %v3757_v46, %v3388_v11  ;;  %v3856_v20 = vmul.f32 %v3757_v46, %v3693_v8  ;;  %v3860_v16 = vmul.f32 %v3757_v46, %v3372_v27 }
 0x2cc   : > { %5808 = vst [vmem:[#allocation18_spill] sm:$0xff] %v3825_v9  ;;  %5809 = vst [vmem:[#allocation19_spill] sm:$0xff] %v3829_v43  ;;  %v3864_v63 = vmul.f32 %v3757_v46, %v3376_v59  ;;  %v3868_v7 = vmul.f32 %v3757_v46, %v3408_v13  ;;  %v3872_v11 = vmul.f32 %v3757_v46, %v3706_v53 }
 0x2cd   : > { %5810 = vst [vmem:[#allocation20_spill] sm:$0xff] %v3832_v23  ;;  %5811 = vst [vmem:[#allocation21_spill] sm:$0xff] %v3840_v5  ;;  %v3876_v8 = vmul.f32 %v3757_v46, %v3412_v32  ;;  %v810_v27 = vmul.f32 %v3761_v45, %v3832_v23  ;;  %v1055_v52 = vmul.f32 %v3763_v34, %v3832_v23  ;;  %v3895_v32 = vld [vmem:[%s5694_s1 + $0x8] ss:$0 sm:$0xff] }
 0x2ce   : > { %5812 = vst [vmem:[#allocation22_spill] sm:$0xff] %v3844_v35  ;;  %5813 = vst [vmem:[#allocation23_spill] sm:$0xff] %v3848_v42  ;;  %v742_v59 = vmul.f32 %v3759_v58, %v3832_v23  ;;  %v1368_v13 = vmul.f32 %v3767_v36, %v3836_v29  ;;  %v1369_v53 = vmul.f32 %v3767_v36, %v3852_v50 }
 0x2cf   : > { %5814 = vst [vmem:[#allocation24_spill] sm:$0xff] %v3856_v20  ;;  %5815 = vst [vmem:[#allocation25_spill] sm:$0xff] %v3860_v16  ;;  %v3890_v48 = vmul.f32 %v3757_v46, %v3398_v24  ;;  %v907_v47 = vrot.slane %v810_v27, 1  ;;  %v1300_v61 = vmul.f32 %v3765_v21, %v3836_v29  ;;  %v1612_v23 = vmul.f32 %v3769_v2, %v3836_v29 }
 0x2d0   : > { %5816 = vst [vmem:[#allocation26_spill] sm:$0xff] %v3864_v63  ;;  %5817 = vst [vmem:[#allocation27_spill] sm:$0xff] %v3872_v11  ;;  %v1613_v11 = vmul.f32 %v3769_v2, %v3852_v50  ;;  %v1152_v63 = vrot.slane %v1055_v52, 2  ;;  %v1464_v16 = vrot.slane %v1368_v13, 1  ;;  %v1465_v20 = vrot.slane %v1369_v53, 1 }
 0x2d1   : > { %v1924_v24 = vmul.f32 %v3773_v41, %v3868_v7  ;;  %v1019_v42 = vadd.f32 %v907_v47, %v742_v59  ;;  %v1708_v35 = vrot.slane %v1612_v23, 2  ;;  %v1925_v27 = vmul.f32 %v3773_v41, %v3876_v8 }
 0x2d2   : > { %v1709_v14 = vrot.slane %v1613_v11, 2  ;;  %v1301_v5 = vmul.f32 %v3765_v21, %v3852_v50  ;;  %v2168_v9 = vmul.f32 %v3895_v32, %v3868_v7  ;;  %v2169_v52 = vmul.f32 %v3895_v32, %v3876_v8 }
 0x2d3   : > { %v2020_v43 = vrot.slane %v1924_v24, 1  ;;  %v1264_v13 = vadd.f32 %v1152_v63, %v1019_v42  ;;  %v1856_v53 = vmul.f32 %v3771_v25, %v3868_v7  ;;  %v2021_v59 = vrot.slane %v1925_v27, 1 }
 0x2d4   : > { %v3917_v23 = vmul.f32 %v3757_v46, %v3424_v56  ;;  %v1466_v11 = vsel %vm906_vm4, %v1464_v16, %v1465_v20  ;;  %v1710_v47 = vsel %vm1151_vm5, %v1708_v35, %v1709_v14  ;;  %v1370_v24 = vmul.f32 %v3767_v36, %v3890_v48 }
 0x2d5   : > { %v1614_v37 = vmul.f32 %v3769_v2, %v3890_v48  ;;  %v1332_v49 = vadd.f32 %v1300_v61, %v1264_v13  ;;  %v1333_v42 = vadd.f32 %v1301_v5, %v1264_v13  ;;  %v2264_v63 = vrot.slane %v2168_v9, 2 }
 0x2d6   : > { %v2265_v62 = vrot.slane %v2169_v52, 2  ;;  %v2022_v27 = vsel %vm906_vm4, %v2020_v43, %v2021_v59  ;;  %v1467_v26 = vrot.slane %v1370_v24, 1  ;;  %v1926_v56 = vmul.f32 %v3773_v41, %v3917_v23 }
 0x2d7   : > { %v1711_v44 = vrot.slane %v1614_v37, 2  ;;  %v1576_v16 = vadd.f32 %v1466_v11, %v1332_v49  ;;  %v2170_v35 = vmul.f32 %v3895_v32, %v3917_v23  ;;  %v3932_v12 = vmul.f32 %v3757_v46, %v3558_v4 }
 0x2d8   : > { %v3936_v5 = vmul.f32 %v3761_v45, %v3777_v38  ;;  %v1468_v9 = vsel %vm906_vm4, %v1465_v20, %v1467_v26  ;;  %v1857_v37 = vmul.f32 %v3771_v25, %v3876_v8  ;;  %v2023_v43 = vrot.slane %v1926_v56, 1 }
 0x2d9   : > { %5818 = vst [vmem:[#allocation28_spill] sm:$0xff] %v3932_v12  ;;  %v3943_v49 = vmul.f32 %v3763_v34, %v3777_v38  ;;  %v1820_v61 = vadd.f32 %v1710_v47, %v1576_v16  ;;  %v2266_v52 = vsel %vm1151_vm5, %v2264_v63, %v2265_v62  ;;  %v1577_v13 = vadd.f32 %v1468_v9, %v1333_v42 }
 0x2da   : > { %v1712_v4 = vsel %vm1151_vm5, %v1709_v14, %v1711_v44  ;;  %v2267_v11 = vrot.slane %v2170_v35, 2  ;;  %v834_v24 = vmul.f32 %v3761_v45, %v3932_v12  ;;  %v5730_v26 = vrot.slane %v3936_v5, 1 }
 0x2db   : > { %v1079_v20 = vmul.f32 %v3763_v34, %v3932_v12  ;;  %v1888_v56 = vadd.f32 %v1856_v53, %v1820_v61  ;;  %v1821_v28 = vadd.f32 %v1712_v4, %v1577_v13  ;;  %v2024_v40 = vsel %vm906_vm4, %v2021_v59, %v2023_v43 }
 0x2dc   : > { %v758_v47 = vmul.f32 %v3759_v58, %v3932_v12  ;;  %v947_v63 = vrot.slane %v834_v24, 1  ;;  %v5729_v14 = vrot.slane %v3943_v49, 2  ;;  %v1392_v44 = vmul.f32 %v3767_v36, %v3781_v6 }
 0x2dd   : > { %v1192_v42 = vrot.slane %v1079_v20, 2  ;;  %v2132_v16 = vadd.f32 %v2022_v27, %v1888_v56  ;;  %v1889_v35 = vadd.f32 %v1857_v37, %v1821_v28  ;;  %v3960_v9 = vmul.f32 %v3767_v36, %v3785_v39 }
 0x2de   : > { %v1636_v53 = vmul.f32 %v3769_v2, %v3781_v6  ;;  %v2268_v59 = vsel %vm1151_vm5, %v2265_v62, %v2267_v11  ;;  %v949_v43 = vsel %vm906_vm4, %v947_v63, %v5730_v26  ;;  %v1504_v61 = vrot.slane %v1392_v44, 1 }
 0x2df   : > { %v3970_v13 = vmul.f32 %v3769_v2, %v3785_v39  ;;  %v2376_v27 = vadd.f32 %v2266_v52, %v2132_v16  ;;  %v2133_v28 = vadd.f32 %v2024_v40, %v1889_v35  ;;  %v1035_v37 = vadd.f32 %v949_v43, %v758_v47 }
 0x2e0   : > { %v5727_v4 = vrot.slane %v3960_v9, 1  ;;  %v1194_v24 = vsel %vm1151_vm5, %v1192_v42, %v5729_v14  ;;  %v1748_v20 = vrot.slane %v1636_v53, 2  ;;  %v1948_v11 = vmul.f32 %v3773_v41, %v3789_v22 }
 0x2e1   : > { %v5726_v62 = vrot.slane %v3970_v13, 2  ;;  %2933 = vmatprep.mubr.msk.f32.mxu0 %vm252_vm0, %v2376_v27  ;;  %v2377_v56 = vadd.f32 %v2268_v59, %v2133_v28  ;;  %v1280_v63 = vadd.f32 %v1194_v24, %v1035_v37  ;;  %v1316_v40 = vmul.f32 %v3765_v21, %v3781_v6 }
 0x2e2   : > { %v3984_v52 = vmul.f32 %v3773_v41, %v3793_v19  ;;  %v1872_v47 = vmul.f32 %v3771_v25, %v3789_v22  ;;  %v2060_v42 = vrot.slane %v1948_v11, 1  ;;  %v2192_v44 = vmul.f32 %v3895_v32, %v3789_v22 }
 0x2e3   : > { %v3992_v16 = vmul.f32 %v3895_v32, %v3793_v19  ;;  %2934 = vmatmul.mubr.msk.f32.vlgmr.msra.gmra.mrb[0].mxu0 %vm252_vm0, %v2377_v56  ;;  %v1348_v35 = vadd.f32 %v1316_v40, %v1280_v63  ;;  %v1506_v53 = vsel %vm906_vm4, %v1504_v61, %v5727_v4  ;;  %v1750_v59 = vsel %vm1151_vm5, %v1748_v20, %v5726_v62 }
 0x2e4   : > { %v5728_v43 = vrot.slane %v3984_v52, 1  ;;  %v2304_v27 = vrot.slane %v2192_v44, 2  ;;  %v4004_v28 = vmul.f32 %v3757_v46, %v3433_v51  ;;  %v4008_v37 = vmul.f32 %v3757_v46, %v3437_v54 }
 0x2e5   : > { %v813_v24 = vmul.f32 %v3761_v45, %v3836_v29  ;;  %v1592_v11 = vadd.f32 %v1506_v53, %v1348_v35  ;;  %v5734_v61 = vrot.slane %v3992_v16, 2  ;;  %v4015_v20 = vmul.f32 %v3761_v45, %v3852_v50 }
 0x2e6   : > { %v1058_v56 = vmul.f32 %v3763_v34, %v3836_v29  ;;  %v2062_v51 = vsel %vm906_vm4, %v2060_v42, %v5728_v43  ;;  %v744_v54 = vmul.f32 %v3759_v58, %v3836_v29  ;;  %v4026_v40 = vmul.f32 %v3763_v34, %v3852_v50 }
 0x2e7   : > { %v912_v63 = vrot.slane %v813_v24, 1  ;;  %v1836_v44 = vadd.f32 %v1750_v59, %v1592_v11  ;;  %v5735_v35 = vrot.slane %v4015_v20, 1  ;;  %v1371_v62 = vmul.f32 %v3767_v36, %v3868_v7 }
 0x2e8   : > { %v1157_v53 = vrot.slane %v1058_v56, 2  ;;  %v5736_v4 = vrot.slane %v4026_v40, 2  ;;  %v4034_v42 = vmul.f32 %v3767_v36, %v3876_v8  ;;  %v1615_v29 = vmul.f32 %v3769_v2, %v3868_v7 }
 0x2e9   : > { %v4040_v24 = vmul.f32 %v3769_v2, %v3876_v8  ;;  %v1904_v59 = vadd.f32 %v1872_v47, %v1836_v44  ;;  %v2306_v11 = vsel %vm1151_vm5, %v2304_v27, %v5734_v61  ;;  %v914_v56 = vsel %vm906_vm4, %v912_v63, %v5735_v35 }
 0x2ea   : > { %v1302_v43 = vmul.f32 %v3765_v21, %v3868_v7  ;;  %v1021_v14 = vadd.f32 %v914_v56, %v744_v54  ;;  %v1159_v26 = vsel %vm1151_vm5, %v1157_v53, %v5736_v4  ;;  %v1469_v12 = vrot.slane %v1371_v62, 1 }
 0x2eb   : > { %v5738_v57 = vrot.slane %v4034_v42, 1  ;;  %v2148_v47 = vadd.f32 %v2062_v51, %v1904_v59  ;;  %v1713_v44 = vrot.slane %v1615_v29, 2  ;;  %v1927_v27 = vmul.f32 %v3773_v41, %v4004_v28 }
 0x2ec   : > { %v4058_v61 = vmul.f32 %v3773_v41, %v4008_v37  ;;  %v1266_v63 = vadd.f32 %v1159_v26, %v1021_v14  ;;  %v5737_v35 = vrot.slane %v4040_v24, 2  ;;  %v2171_v54 = vmul.f32 %v3895_v32, %v4004_v28 }
 0x2ed   : > { %v4065_v62 = vmul.f32 %v3895_v32, %v4008_v37  ;;  %v4069_v51 = vmul.f32 %v3757_v46, %v3380_v60  ;;  %v2392_v53 = vadd.f32 %v2306_v11, %v2148_v47  ;;  %v2025_v29 = vrot.slane %v1927_v27, 1 }
 0x2ee   : > { %v5739_v59 = vrot.slane %v4058_v61, 1  ;;  %v1334_v56 = vadd.f32 %v1302_v43, %v1266_v63  ;;  %v1471_v26 = vsel %vm906_vm4, %v1469_v12, %v5738_v57  ;;  %v1858_v14 = vmul.f32 %v3771_v25, %v4004_v28 }
 0x2ef   : > { %5819 = vst [vmem:[#allocation29_spill] sm:$0xff] %v4069_v51  ;;  %v4079_v4 = vmul.f32 %v3757_v46, %v3574_v33  ;;  %2957 = vmatprep.mubr.msk.f32.mxu1 %vm252_vm0, %v2392_v53  ;;  %v2269_v60 = vrot.slane %v2171_v54, 2  ;;  %v5746_v11 = vrot.slane %v4065_v62, 2  ;;  %v4085_v47 = vmul.f32 %v3757_v46, %v3599_v1 }
 0x2f0   : > { %v4089_v43 = vmul.f32 %v3757_v46, %v3624_v18  ;;  %v1578_v12 = vadd.f32 %v1471_v26, %v1334_v56  ;;  %v1715_v27 = vsel %vm1151_vm5, %v1713_v44, %v5737_v35  ;;  %v2027_v1 = vsel %vm906_vm4, %v2025_v29, %v5739_v59 }
 0x2f1   : > { %5820 = vst [vmem:[#allocation30_spill] sm:$0xff] %v4079_v4  ;;  %v836_v33 = vmul.f32 %v3761_v45, %v4079_v4  ;;  %v1081_v63 = vmul.f32 %v3763_v34, %v4079_v4  ;;  %v759_v54 = vmul.f32 %v3759_v58, %v3777_v38  ;;  %v1394_v18 = vmul.f32 %v3767_v36, %v4085_v47 }
 0x2f2   : > { %v1638_v53 = vmul.f32 %v3769_v2, %v4085_v47  ;;  %v1822_v44 = vadd.f32 %v1715_v27, %v1578_v12  ;;  %v1950_v35 = vmul.f32 %v3773_v41, %v4089_v43  ;;  %v2271_v57 = vsel %vm1151_vm5, %v2269_v60, %v5746_v11 }
 0x2f3   : > { %v950_v56 = vrot.slane %v836_v33, 1  ;;  %v1195_v26 = vrot.slane %v1081_v63, 2  ;;  %v1317_v29 = vmul.f32 %v3765_v21, %v3785_v39  ;;  %v1507_v59 = vrot.slane %v1394_v18, 1 }
 0x2f4   : > { %v1751_v4 = vrot.slane %v1638_v53, 2  ;;  %v1890_v51 = vadd.f32 %v1858_v14, %v1822_v44  ;;  %v5821_v38 = vrot.slane %v3936_v5, 1  ;;  %v1873_v12 = vmul.f32 %v3771_v25, %v3793_v19 }
 0x2f5   : > { %v2194_v27 = vmul.f32 %v3895_v32, %v4089_v43  ;;  %v5822_v63 = vrot.slane %v3943_v49, 2  ;;  %v2063_v11 = vrot.slane %v1950_v35, 1  ;;  %v760_v18 = vmul.f32 %v3759_v58, %v3781_v6 }
 0x2f6   : > { %v951_v30 = vsel %vm906_vm4, %v5821_v38, %v950_v56  ;;  %v2134_v14 = vadd.f32 %v2027_v1, %v1890_v51  ;;  %v5823_v5 = vrot.slane %v3960_v9, 1  ;;  %v837_v53 = vmul.f32 %v3761_v45, %v3781_v6 }
 0x2f7   : > { %v1036_v33 = vadd.f32 %v951_v30, %v759_v54  ;;  %v1196_v60 = vsel %vm1151_vm5, %v5822_v63, %v1195_v26  ;;  %v4133_v44 = vmul.f32 %v3761_v45, %v3785_v39  ;;  %v5824_v49 = vrot.slane %v3970_v13, 2 }
 0x2f8   : > { %v1508_v38 = vsel %vm906_vm4, %v5823_v5, %v1507_v59  ;;  %v1082_v54 = vmul.f32 %v3763_v34, %v3781_v6  ;;  %v4142_v9 = vmul.f32 %v3763_v34, %v3785_v39  ;;  %v2378_v51 = vadd.f32 %v2271_v57, %v2134_v14 }
 0x2f9   : > { %v1281_v30 = vadd.f32 %v1196_v60, %v1036_v33  ;;  %v1752_v35 = vsel %vm1151_vm5, %v5824_v49, %v1751_v4  ;;  %v2307_v59 = vrot.slane %v2194_v27, 2  ;;  %v952_v1 = vrot.slane %v837_v53, 1 }
 0x2fa   : > { %v5747_v56 = vrot.slane %v4133_v44, 1  ;;  %v1197_v63 = vrot.slane %v1082_v54, 2  ;;  %v1198_v33 = vrot.slane %v4142_v9, 2  ;;  %v1395_v13 = vmul.f32 %v3767_v36, %v3789_v22  ;;  %2936 = vmatprep.mubr.msk.f32.mxu0 %vm252_vm0, %v2378_v51 }
 0x2fb   : > { %v1349_v26 = vadd.f32 %v1317_v29, %v1281_v30  ;;  %v4154_v57 = vmul.f32 %v3767_v36, %v3793_v19  ;;  %v1639_v27 = vmul.f32 %v3769_v2, %v3789_v22  ;;  %v4160_v29 = vmul.f32 %v3769_v2, %v3793_v19 }
 0x2fc   : > { %v954_v4 = vsel %vm906_vm4, %v952_v1, %v5747_v56  ;;  %v1318_v5 = vmul.f32 %v3765_v21, %v3789_v22  ;;  %v1509_v53 = vrot.slane %v1395_v13, 1  ;;  %v1199_v30 = vsel %vm1151_vm5, %v1197_v63, %v1198_v33 }
 0x2fd   : > { %v1593_v60 = vadd.f32 %v1508_v38, %v1349_v26  ;;  %v1037_v14 = vadd.f32 %v954_v4, %v760_v18  ;;  %v1510_v49 = vrot.slane %v4154_v57, 1  ;;  %v1753_v54 = vrot.slane %v1639_v27, 2 }
 0x2fe   : > { %v5750_v51 = vrot.slane %v4160_v29, 2  ;;  %v1951_v6 = vmul.f32 %v3773_v41, %v3797_v55  ;;  %v4173_v18 = vmul.f32 %v3773_v41, %v3801_v17  ;;  %v5825_v38 = vrot.slane %v3984_v52, 1 }
 0x2ff   : > { %v1837_v1 = vadd.f32 %v1752_v35, %v1593_v60  ;;  %v1282_v56 = vadd.f32 %v1199_v30, %v1037_v14  ;;  %v5826_v63 = vrot.slane %v3992_v16, 2  ;;  %v2195_v4 = vmul.f32 %v3895_v32, %v3797_v55 }
 0x300   : > { %v2064_v26 = vsel %vm906_vm4, %v5825_v38, %v2063_v11  ;;  %v4185_v35 = vmul.f32 %v3895_v32, %v3801_v17  ;;  %v1511_v14 = vsel %vm906_vm4, %v1509_v53, %v1510_v49  ;;  %v1874_v52 = vmul.f32 %v3771_v25, %v3797_v55 }
 0x301   : > { %v2308_v13 = vsel %vm1151_vm5, %v5826_v63, %v2307_v59  ;;  %v1905_v27 = vadd.f32 %v1873_v12, %v1837_v1  ;;  %v1350_v60 = vadd.f32 %v1318_v5, %v1282_v56  ;;  %v1755_v16 = vsel %vm1151_vm5, %v1753_v54, %v5750_v51 }
 0x302   : > { %v2065_v11 = vrot.slane %v1951_v6, 1  ;;  %v2066_v59 = vrot.slane %v4173_v18, 1  ;;  %v4198_v30 = vmul.f32 %v3757_v46, %v3449_v10  ;;  %v2309_v5 = vrot.slane %v2195_v4, 2 }
 0x303   : > { %v2149_v12 = vadd.f32 %v2064_v26, %v1905_v27  ;;  %v1594_v56 = vadd.f32 %v1511_v14, %v1350_v60  ;;  %v815_v53 = vmul.f32 %v3761_v45, %v3890_v48  ;;  %v2310_v1 = vrot.slane %v4185_v35, 2 }
 0x304   : > { %v745_v38 = vmul.f32 %v3759_v58, %v3852_v50  ;;  %v1060_v6 = vmul.f32 %v3763_v34, %v3890_v48  ;;  %v1373_v54 = vmul.f32 %v3767_v36, %v3917_v23  ;;  %v1617_v26 = vmul.f32 %v3769_v2, %v3917_v23 }
 0x305   : > { %v2393_v63 = vadd.f32 %v2308_v13, %v2149_v12  ;;  %v1838_v10 = vadd.f32 %v1755_v16, %v1594_v56  ;;  %v915_v51 = vrot.slane %v815_v53, 1  ;;  %v2067_v4 = vsel %vm906_vm4, %v2065_v11, %v2066_v59 }
 0x306   : > { %v1160_v27 = vrot.slane %v1060_v6, 2  ;;  %v1472_v60 = vrot.slane %v1373_v54, 1  ;;  %v1929_v50 = vmul.f32 %v3773_v41, %v4198_v30  ;;  %v5827_v14 = vrot.slane %v4015_v20, 1 }
 0x307   : > { %2958 = vmatmul.mubr.msk.f32.vlgmr.msra.gmra.mrb[0].mxu1 %vm252_vm0, %v2393_v63  ;;  %v1906_v48 = vadd.f32 %v1874_v52, %v1838_v10  ;;  %v1716_v16 = vrot.slane %v1617_v26, 2  ;;  %v2173_v12 = vmul.f32 %v3895_v32, %v4198_v30  ;;  %v2311_v11 = vsel %vm1151_vm5, %v2309_v5, %v2310_v1 }
 0x308   : > { %v916_v13 = vsel %vm906_vm4, %v5827_v14, %v915_v51  ;;  %v1303_v53 = vmul.f32 %v3765_v21, %v3876_v8  ;;  %v1859_v6 = vmul.f32 %v3771_v25, %v4008_v37  ;;  %v5828_v20 = vrot.slane %v4026_v40, 2 }
 0x309   : > { %v1022_v56 = vadd.f32 %v916_v13, %v745_v38  ;;  %v2150_v52 = vadd.f32 %v2067_v4, %v1906_v48  ;;  %v5829_v54 = vrot.slane %v4034_v42, 1  ;;  %v2028_v10 = vrot.slane %v1929_v50, 1 }
 0x30a   : > { %v1161_v51 = vsel %vm1151_vm5, %v5828_v20, %v1160_v27  ;;  %v5830_v5 = vrot.slane %v4040_v24, 2  ;;  %v2272_v14 = vrot.slane %v2173_v12, 2  ;;  %v4240_v13 = vmul.f32 %v3757_v46, %v3458_v31 }
 0x30b   : > { %v1473_v63 = vsel %vm906_vm4, %v5829_v54, %v1472_v60  ;;  %v1267_v26 = vadd.f32 %v1161_v51, %v1022_v56  ;;  %v2394_v4 = vadd.f32 %v2311_v11, %v2150_v52  ;;  %v4244_v40 = vmul.f32 %v3757_v46, %v3462_v15 }
 0x30c   : > { %v1717_v38 = vsel %vm1151_vm5, %v5830_v5, %v1716_v16  ;;  %v816_v42 = vmul.f32 %v3761_v45, %v3868_v7  ;;  %v4250_v27 = vmul.f32 %v3761_v45, %v3876_v8  ;;  %v746_v60 = vmul.f32 %v3759_v58, %v3868_v7 }
 0x30d   : > { %v1335_v24 = vadd.f32 %v1303_v53, %v1267_v26  ;;  %v1061_v31 = vmul.f32 %v3763_v34, %v3868_v7  ;;  %v4258_v50 = vmul.f32 %v3763_v34, %v3876_v8  ;;  %2960 = vmatprep.mubr.msk.f32.mxu1 %vm252_vm0, %v2394_v4  ;;  %v1374_v16 = vmul.f32 %v3767_v36, %v4004_v28 }
 0x30e   : > { %v917_v15 = vrot.slane %v816_v42, 1  ;;  %v5751_v48 = vrot.slane %v4250_v27, 1  ;;  %v4266_v12 = vmul.f32 %v3767_v36, %v4008_v37  ;;  %v1618_v53 = vmul.f32 %v3769_v2, %v4004_v28 }
 0x30f   : > { %v1579_v11 = vadd.f32 %v1473_v63, %v1335_v24  ;;  %v1162_v56 = vrot.slane %v1061_v31, 2  ;;  %v5755_v7 = vrot.slane %v4258_v50, 2  ;;  %v1474_v20 = vrot.slane %v1374_v16, 1 }
 0x310   : > { %v919_v52 = vsel %vm906_vm4, %v917_v15, %v5751_v48  ;;  %v5753_v51 = vrot.slane %v4266_v12, 1  ;;  %v4277_v54 = vmul.f32 %v3769_v2, %v4008_v37  ;;  %v5831_v63 = vrot.slane %v4058_v61, 1 }
 0x311   : > { %v1823_v26 = vadd.f32 %v1717_v38, %v1579_v11  ;;  %v1023_v4 = vadd.f32 %v919_v52, %v746_v60  ;;  %v1304_v42 = vmul.f32 %v3765_v21, %v4004_v28  ;;  %v1164_v24 = vsel %vm1151_vm5, %v1162_v56, %v5755_v7 }
 0x312   : > { %v2029_v5 = vsel %vm906_vm4, %v5831_v63, %v2028_v10  ;;  %v1718_v31 = vrot.slane %v1618_v53, 2  ;;  %v5752_v15 = vrot.slane %v4277_v54, 2  ;;  %v1930_v16 = vmul.f32 %v3773_v41, %v4240_v13 }
 0x313   : > { %v1891_v48 = vadd.f32 %v1859_v6, %v1823_v26  ;;  %v1268_v38 = vadd.f32 %v1164_v24, %v1023_v4  ;;  %v4292_v61 = vmul.f32 %v3773_v41, %v4244_v40  ;;  %v2174_v10 = vmul.f32 %v3895_v32, %v4240_v13 }
 0x314   : > { %v5832_v60 = vrot.slane %v4065_v62, 2  ;;  %v1476_v56 = vsel %vm906_vm4, %v1474_v20, %v5753_v51  ;;  %v2030_v53 = vrot.slane %v1930_v16, 1  ;;  %v4304_v6 = vmul.f32 %v3895_v32, %v4244_v40 }
 0x315   : > { %v2135_v52 = vadd.f32 %v2029_v5, %v1891_v48  ;;  %v1336_v26 = vadd.f32 %v1304_v42, %v1268_v38  ;;  %v5754_v63 = vrot.slane %v4292_v61, 1  ;;  %v4309_v4 = vmul.f32 %v3757_v46, %v3647_v3 }
 0x316   : > { %v2273_v11 = vsel %vm1151_vm5, %v5832_v60, %v2272_v14  ;;  %v1720_v62 = vsel %vm1151_vm5, %v1718_v31, %v5752_v15  ;;  %v1860_v14 = vmul.f32 %v3771_v25, %v4240_v13  ;;  %v839_v20 = vmul.f32 %v3761_v45, %v4085_v47 }
 0x317   : > { %v1084_v48 = vmul.f32 %v3763_v34, %v4085_v47  ;;  %v2379_v5 = vadd.f32 %v2273_v11, %v2135_v52  ;;  %v1580_v42 = vadd.f32 %v1476_v56, %v1336_v26  ;;  %v2274_v24 = vrot.slane %v2174_v10, 2 }
 0x318   : > { %v2275_v16 = vrot.slane %v4304_v6, 2  ;;  %v761_v3 = vmul.f32 %v3759_v58, %v3785_v39  ;;  %v955_v38 = vrot.slane %v839_v20, 1  ;;  %v1397_v31 = vmul.f32 %v3767_v36, %v4089_v43 }
 0x319   : > { %v1200_v60 = vrot.slane %v1084_v48, 2  ;;  %2937 = vmatmul.mubr.msk.f32.gmra.mrb[2].mxu0 %vm252_vm0, %v2379_v5  ;;  %v1824_v15 = vadd.f32 %v1720_v62, %v1580_v42  ;;  %v2032_v51 = vsel %vm906_vm4, %v2030_v53, %v5754_v63  ;;  %v1641_v10 = vmul.f32 %v3769_v2, %v4089_v43 }
 0x31a   : > { %v1953_v11 = vmul.f32 %v3773_v41, %v4309_v4  ;;  %v5833_v56 = vrot.slane %v4133_v44, 1  ;;  %v1319_v26 = vmul.f32 %v3765_v21, %v3793_v19  ;;  %v1512_v20 = vrot.slane %v1397_v31, 1 }
 0x31b   : > { %v2197_v62 = vmul.f32 %v3895_v32, %v4309_v4  ;;  %v1892_v48 = vadd.f32 %v1860_v14, %v1824_v15  ;;  %v2276_v53 = vsel %vm1151_vm5, %v2274_v24, %v2275_v16  ;;  %v1756_v42 = vrot.slane %v1641_v10, 2 }
 0x31c   : > { %v956_v52 = vsel %vm906_vm4, %v5833_v56, %v955_v38  ;;  %v1201_v44 = vsel %vm1151_vm5, %v1198_v33, %v1200_v60  ;;  %v1875_v38 = vmul.f32 %v3771_v25, %v3801_v17  ;;  %v2068_v56 = vrot.slane %v1953_v11, 1 }
 0x31d   : > { %v1038_v5 = vadd.f32 %v956_v52, %v761_v3  ;;  %v840_v31 = vmul.f32 %v3761_v45, %v3789_v22  ;;  %v2136_v63 = vadd.f32 %v2032_v51, %v1892_v48  ;;  %v1513_v15 = vsel %vm906_vm4, %v1510_v49, %v1512_v20 }
 0x31e   : > { %v2312_v14 = vrot.slane %v2197_v62, 2  ;;  %v762_v24 = vmul.f32 %v3759_v58, %v3789_v22  ;;  %v4357_v9 = vmul.f32 %v3761_v45, %v3793_v19  ;;  %v1085_v3 = vmul.f32 %v3763_v34, %v3789_v22 }
 0x31f   : > { %v1283_v7 = vadd.f32 %v1201_v44, %v1038_v5  ;;  %v957_v33 = vrot.slane %v840_v31, 1  ;;  %v2380_v60 = vadd.f32 %v2276_v53, %v2136_v63  ;;  %v5834_v51 = vrot.slane %v4160_v29, 2 }
 0x320   : > { %v4366_v49 = vmul.f32 %v3763_v34, %v3793_v19  ;;  %v958_v11 = vrot.slane %v4357_v9, 1  ;;  %v1202_v52 = vrot.slane %v1085_v3, 2  ;;  %v1398_v20 = vmul.f32 %v3767_v36, %v3797_v55 }
 0x321   : > { %v1351_v10 = vadd.f32 %v1319_v26, %v1283_v7  ;;  %v1757_v57 = vsel %vm1151_vm5, %v5834_v51, %v1756_v42  ;;  %v4373_v62 = vmul.f32 %v3767_v36, %v3801_v17  ;;  %2939 = vmatprep.mubr.msk.f32.mxu0 %vm252_vm0, %v2380_v60  ;;  %v1642_v7 = vmul.f32 %v3769_v2, %v3797_v55 }
 0x322   : > { %v1203_v29 = vrot.slane %v4366_v49, 2  ;;  %v4381_v63 = vmul.f32 %v3769_v2, %v3801_v17  ;;  %v2069_v26 = vsel %vm906_vm4, %v2066_v59, %v2068_v56  ;;  %v959_v48 = vsel %vm906_vm4, %v957_v33, %v958_v11  ;;  %v5835_v56 = vld [vmem:[#allocation4_spill] sm:$0xff] }
 0x323   : > { %v1595_v22 = vadd.f32 %v1513_v15, %v1351_v10  ;;  %v1320_v53 = vmul.f32 %v3765_v21, %v3797_v55  ;;  %v1514_v5 = vrot.slane %v1398_v20, 1  ;;  %v1039_v44 = vadd.f32 %v959_v48, %v762_v24 }
 0x324   : > { %v1204_v31 = vsel %vm1151_vm5, %v1202_v52, %v1203_v29  ;;  %v1515_v15 = vrot.slane %v4373_v62, 1  ;;  %v1758_v3 = vrot.slane %v1642_v7, 2  ;;  %v5757_v18 = vrot.slane %v4381_v63, 2 }
 0x325   : > { %v1839_v42 = vadd.f32 %v1757_v57, %v1595_v22  ;;  %v1954_v59 = vmul.f32 %v3773_v41, %v3805_v0  ;;  %v4400_v33 = vmul.f32 %v3773_v41, %v5835_v56  ;;  %v1284_v10 = vadd.f32 %v1204_v31, %v1039_v44 }
 0x326   : > { %v2198_v24 = vmul.f32 %v3895_v32, %v3805_v0  ;;  %v4406_v51 = vmul.f32 %v3895_v32, %v5835_v56  ;;  %v2313_v57 = vsel %vm1151_vm5, %v2310_v1, %v2312_v14  ;;  %v1876_v52 = vmul.f32 %v3771_v25, %v3805_v0 }
 0x327   : > { %v1907_v60 = vadd.f32 %v1875_v38, %v1839_v42  ;;  %v2070_v20 = vrot.slane %v1954_v59, 1  ;;  %v5756_v22 = vrot.slane %v4400_v33, 1  ;;  %v1352_v38 = vadd.f32 %v1320_v53, %v1284_v10  ;;  %v5836_v42 = vld [vmem:[#allocation7_spill] sm:$0xff] }
 0x328   : > { %v1516_v48 = vsel %vm906_vm4, %v1514_v5, %v1515_v15  ;;  %v4419_v44 = vmul.f32 %v3757_v46, %v5836_v42  ;;  %v2314_v31 = vrot.slane %v2198_v24, 2  ;;  %v5758_v35 = vrot.slane %v4406_v51, 2 }
 0x329   : > { %v2151_v7 = vadd.f32 %v2069_v26, %v1907_v60  ;;  %v818_v1 = vmul.f32 %v3761_v45, %v3917_v23  ;;  %v1063_v14 = vmul.f32 %v3763_v34, %v3917_v23  ;;  %v1596_v26 = vadd.f32 %v1516_v48, %v1352_v38 }
 0x32a   : > { %v1760_v53 = vsel %vm1151_vm5, %v1758_v3, %v5757_v18  ;;  %v2072_v5 = vsel %vm906_vm4, %v2070_v20, %v5756_v22  ;;  %v1376_v24 = vmul.f32 %v3767_v36, %v4198_v30  ;;  %v1620_v42 = vmul.f32 %v3769_v2, %v4198_v30 }
 0x32b   : > { %v2395_v59 = vadd.f32 %v2313_v57, %v2151_v7  ;;  %v920_v60 = vrot.slane %v818_v1, 1  ;;  %v1165_v10 = vrot.slane %v1063_v14, 2  ;;  %v1840_v23 = vadd.f32 %v1760_v53, %v1596_v26 }
 0x32c   : > { %v747_v57 = vmul.f32 %v3759_v58, %v3876_v8  ;;  %v1932_v3 = vmul.f32 %v3773_v41, %v4419_v44  ;;  %v2176_v20 = vmul.f32 %v3895_v32, %v4419_v44  ;;  %v2316_v7 = vsel %vm1151_vm5, %v2314_v31, %v5758_v35 }
 0x32d   : > { %2961 = vmatmul.mubr.msk.f32.gmra.mrb[2].mxu1 %vm252_vm0, %v2395_v59  ;;  %v5837_v38 = vrot.slane %v4250_v27, 1  ;;  %v1477_v1 = vrot.slane %v1376_v24, 1  ;;  %v1721_v14 = vrot.slane %v1620_v42, 2  ;;  %v1908_v59 = vadd.f32 %v1876_v52, %v1840_v23 }
 0x32e   : > { %v1305_v8 = vmul.f32 %v3765_v21, %v4008_v37  ;;  %v1861_v53 = vmul.f32 %v3771_v25, %v4244_v40  ;;  %v5838_v22 = vrot.slane %v4258_v50, 2  ;;  %v5839_v31 = vrot.slane %v4266_v12, 1 }
 0x32f   : > { %v921_v48 = vsel %vm906_vm4, %v5837_v38, %v920_v60  ;;  %v2033_v35 = vrot.slane %v1932_v3, 1  ;;  %v2277_v60 = vrot.slane %v2176_v20, 2  ;;  %v2152_v24 = vadd.f32 %v2072_v5, %v1908_v59 }
 0x330   : > { %v1024_v26 = vadd.f32 %v921_v48, %v747_v57  ;;  %v1166_v18 = vsel %vm1151_vm5, %v5838_v22, %v1165_v10  ;;  %v1478_v27 = vsel %vm906_vm4, %v5839_v31, %v1477_v1  ;;  %v5840_v52 = vrot.slane %v4277_v54, 2  ;;  %v5841_v57 = vld [vmem:[#allocation8_spill] sm:$0xff]  ;;  %v5842_v48 = vld [vmem:[#allocation9_spill] sm:$0xff] }
 0x331   : > { %v4464_v38 = vmul.f32 %v3757_v46, %v5841_v57  ;;  %v4468_v50 = vmul.f32 %v3757_v46, %v5842_v48  ;;  %v819_v12 = vmul.f32 %v3761_v45, %v4004_v28  ;;  %v4474_v22 = vmul.f32 %v3761_v45, %v4008_v37 }
 0x332   : > { %v1269_v42 = vadd.f32 %v1166_v18, %v1024_v26  ;;  %v1722_v23 = vsel %vm1151_vm5, %v5840_v52, %v1721_v14  ;;  %v1064_v54 = vmul.f32 %v3763_v34, %v4004_v28  ;;  %v2396_v18 = vadd.f32 %v2316_v7, %v2152_v24 }
 0x333   : > { %v748_v10 = vmul.f32 %v3759_v58, %v4004_v28  ;;  %v4482_v3 = vmul.f32 %v3763_v34, %v4008_v37  ;;  %v922_v20 = vrot.slane %v819_v12, 1  ;;  %v923_v1 = vrot.slane %v4474_v22, 1 }
 0x334   : > { %v1337_v5 = vadd.f32 %v1305_v8, %v1269_v42  ;;  %v1167_v14 = vrot.slane %v1064_v54, 2  ;;  %v1377_v59 = vmul.f32 %v3767_v36, %v4240_v13  ;;  %2963 = vmatprep.mubr.msk.f32.mxu1 %vm252_vm0, %v2396_v18  ;;  %v4491_v8 = vmul.f32 %v3767_v36, %v4244_v40 }
 0x335   : > { %v5760_v7 = vrot.slane %v4482_v3, 2  ;;  %v1621_v28 = vmul.f32 %v3769_v2, %v4240_v13  ;;  %v5843_v31 = vrot.slane %v4292_v61, 1  ;;  %v924_v42 = vsel %vm906_vm4, %v922_v20, %v923_v1 }
 0x336   : > { %v1581_v26 = vadd.f32 %v1478_v27, %v1337_v5  ;;  %v1479_v52 = vrot.slane %v1377_v59, 1  ;;  %v4503_v27 = vmul.f32 %v3769_v2, %v4244_v40  ;;  %v1025_v48 = vadd.f32 %v924_v42, %v748_v10 }
 0x337   : > { %v2034_v24 = vsel %vm906_vm4, %v5843_v31, %v2033_v35  ;;  %v1169_v12 = vsel %vm1151_vm5, %v1167_v14, %v5760_v7  ;;  %v5759_v54 = vrot.slane %v4491_v8, 1  ;;  %v1723_v61 = vrot.slane %v1621_v28, 2 }
 0x338   : > { %v1825_v57 = vadd.f32 %v1722_v23, %v1581_v26  ;;  %v1724_v35 = vrot.slane %v4503_v27, 2  ;;  %v1933_v18 = vmul.f32 %v3773_v41, %v4464_v38  ;;  %v4514_v5 = vmul.f32 %v3773_v41, %v4468_v50 }
 0x339   : > { %v1270_v59 = vadd.f32 %v1169_v12, %v1025_v48  ;;  %v1306_v23 = vmul.f32 %v3765_v21, %v4240_v13  ;;  %v2177_v10 = vmul.f32 %v3895_v32, %v4464_v38  ;;  %v2278_v14 = vsel %vm1151_vm5, %v2275_v16, %v2277_v60 }
 0x33a   : > { %v1893_v20 = vadd.f32 %v1861_v53, %v1825_v57  ;;  %v1481_v26 = vsel %vm906_vm4, %v1479_v52, %v5759_v54  ;;  %v1862_v28 = vmul.f32 %v3771_v25, %v4464_v38  ;;  %v4530_v53 = vmul.f32 %v3895_v32, %v4468_v50 }
 0x33b   : > { %v1338_v42 = vadd.f32 %v1306_v23, %v1270_v59  ;;  %v2035_v57 = vrot.slane %v1933_v18, 1  ;;  %v2036_v48 = vrot.slane %v4514_v5, 1  ;;  %v1725_v6 = vsel %vm1151_vm5, %v1723_v61, %v1724_v35 }
 0x33c   : > { %v2137_v31 = vadd.f32 %v2034_v24, %v1893_v20  ;;  %v2279_v16 = vrot.slane %v2177_v10, 2  ;;  %v842_v60 = vmul.f32 %v3761_v45, %v4089_v43  ;;  %v1087_v52 = vmul.f32 %v3763_v34, %v4089_v43 }
 0x33d   : > { %v1582_v54 = vadd.f32 %v1481_v26, %v1338_v42  ;;  %v2280_v7 = vrot.slane %v4530_v53, 2  ;;  %v1400_v24 = vmul.f32 %v3767_v36, %v4309_v4  ;;  %v763_v18 = vmul.f32 %v3759_v58, %v3793_v19 }
 0x33e   : > { %v2381_v12 = vadd.f32 %v2278_v14, %v2137_v31  ;;  %v960_v20 = vrot.slane %v842_v60, 1  ;;  %v1205_v59 = vrot.slane %v1087_v52, 2  ;;  %v1644_v61 = vmul.f32 %v3769_v2, %v4309_v4  ;;  %v5844_v14 = vld [vmem:[#allocation5_spill] sm:$0xff] }
 0x33f   : > { %v1826_v23 = vadd.f32 %v1725_v6, %v1582_v54  ;;  %v2037_v43 = vsel %vm906_vm4, %v2035_v57, %v2036_v48  ;;  %v1517_v10 = vrot.slane %v1400_v24, 1  ;;  %v1956_v26 = vmul.f32 %v3773_v41, %v5844_v14 }
 0x340   : > { %2940 = vmatmul.mubr.msk.f32.gmra.mrb[4].mxu0 %vm252_vm0, %v2381_v12  ;;  %v961_v19 = vsel %vm906_vm4, %v958_v11, %v960_v20  ;;  %v1321_v31 = vmul.f32 %v3765_v21, %v3801_v17  ;;  %v1761_v42 = vrot.slane %v1644_v61, 2  ;;  %v2200_v60 = vmul.f32 %v3895_v32, %v5844_v14 }
 0x341   : > { %v1894_v54 = vadd.f32 %v1862_v28, %v1826_v23  ;;  %v2281_v57 = vsel %vm1151_vm5, %v2279_v16, %v2280_v7  ;;  %v1040_v6 = vadd.f32 %v961_v19, %v763_v18  ;;  %v1877_v52 = vmul.f32 %v3771_v25, %v5835_v56 }
 0x342   : > { %v1206_v9 = vsel %vm1151_vm5, %v1203_v29, %v1205_v59  ;;  %v1518_v11 = vsel %vm906_vm4, %v1515_v15, %v1517_v10  ;;  %v2073_v12 = vrot.slane %v1956_v26, 1  ;;  %v843_v28 = vmul.f32 %v3761_v45, %v3797_v55 }
 0x343   : > { %v2138_v24 = vadd.f32 %v2037_v43, %v1894_v54  ;;  %v1285_v20 = vadd.f32 %v1206_v9, %v1040_v6  ;;  %v5845_v16 = vrot.slane %v4381_v63, 2  ;;  %v4578_v61 = vmul.f32 %v3761_v45, %v3801_v17 }
 0x344   : > { %v2317_v49 = vrot.slane %v2200_v60, 2  ;;  %v962_v29 = vrot.slane %v843_v28, 1  ;;  %v1088_v62 = vmul.f32 %v3763_v34, %v3797_v55  ;;  %v4584_v15 = vmul.f32 %v3763_v34, %v3801_v17 }
 0x345   : > { %v1762_v18 = vsel %vm1151_vm5, %v5845_v16, %v1761_v42  ;;  %v2382_v59 = vadd.f32 %v2281_v57, %v2138_v24  ;;  %v1353_v23 = vadd.f32 %v1321_v31, %v1285_v20  ;;  %v764_v63 = vmul.f32 %v3759_v58, %v3797_v55 }
 0x346   : > { %v963_v43 = vrot.slane %v4578_v61, 1  ;;  %v1207_v10 = vrot.slane %v1088_v62, 2  ;;  %v5761_v26 = vrot.slane %v4584_v15, 2  ;;  %v1401_v19 = vmul.f32 %v3767_v36, %v3805_v0 }
 0x347   : > { %v4594_v42 = vmul.f32 %v3767_v36, %v5835_v56  ;;  %2942 = vmatprep.mubr.msk.f32.mxu0 %vm252_vm0, %v2382_v59  ;;  %v1597_v60 = vadd.f32 %v1518_v11, %v1353_v23  ;;  %v1645_v55 = vmul.f32 %v3769_v2, %v3805_v0  ;;  %v4604_v54 = vmul.f32 %v3769_v2, %v5835_v56  ;;  %v5848_v23 = vld [vmem:[#allocation6_spill] sm:$0xff] }
 0x348   : > { %v964_v31 = vsel %vm906_vm4, %v962_v29, %v963_v43  ;;  %v5846_v57 = vrot.slane %v4400_v33, 1  ;;  %v1519_v28 = vrot.slane %v1401_v19, 1  ;;  %v5847_v20 = vrot.slane %v4406_v51, 2 }
 0x349   : > { %v1041_v9 = vadd.f32 %v964_v31, %v764_v63  ;;  %v1520_v24 = vrot.slane %v4594_v42, 1  ;;  %v1841_v11 = vadd.f32 %v1762_v18, %v1597_v60  ;;  %v1209_v29 = vsel %vm1151_vm5, %v1207_v10, %v5761_v26  ;;  %v5849_v63 = vld [vmem:[#allocation17_spill] sm:$0xff] }
 0x34a   : > { %v2074_v6 = vsel %vm906_vm4, %v5846_v57, %v2073_v12  ;;  %v2318_v16 = vsel %vm1151_vm5, %v5847_v20, %v2317_v49  ;;  %v1322_v62 = vmul.f32 %v3765_v21, %v3805_v0  ;;  %v1763_v33 = vrot.slane %v1645_v55, 2  ;;  %v5850_v20 = vld [vmem:[#allocation10_spill] sm:$0xff] }
 0x34b   : > { %v1286_v59 = vadd.f32 %v1209_v29, %v1041_v9  ;;  %v1957_v12 = vmul.f32 %v3773_v41, %v5848_v23  ;;  %v4622_v19 = vmul.f32 %v3773_v41, %v5849_v63  ;;  %v1909_v18 = vadd.f32 %v1877_v52, %v1841_v11 }
 0x34c   : > { %v5763_v51 = vrot.slane %v4604_v54, 2  ;;  %v2201_v49 = vmul.f32 %v3895_v32, %v5848_v23  ;;  %v4629_v10 = vmul.f32 %v3895_v32, %v5849_v63  ;;  %v1521_v31 = vsel %vm906_vm4, %v1519_v28, %v1520_v24 }
 0x34d   : > { %v1354_v60 = vadd.f32 %v1322_v62, %v1286_v59  ;;  %v1878_v55 = vmul.f32 %v3771_v25, %v5848_v23  ;;  %v2075_v57 = vrot.slane %v1957_v12, 1  ;;  %v2153_v9 = vadd.f32 %v2074_v6, %v1909_v18 }
 0x34e   : > { %v5762_v52 = vrot.slane %v4622_v19, 1  ;;  %v2319_v11 = vrot.slane %v2201_v49, 2  ;;  %v4639_v29 = vmul.f32 %v3757_v46, %v5850_v20  ;;  %v5764_v32 = vrot.slane %v4629_v10, 2 }
 0x34f   : > { %v1598_v26 = vadd.f32 %v1521_v31, %v1354_v60  ;;  %v821_v62 = vmul.f32 %v3761_v45, %v4198_v30  ;;  %v1066_v28 = vmul.f32 %v3763_v34, %v4198_v30  ;;  %v2397_v59 = vadd.f32 %v2318_v16, %v2153_v9 }
 0x350   : > { %v1765_v6 = vsel %vm1151_vm5, %v1763_v33, %v5763_v51  ;;  %v749_v12 = vmul.f32 %v3759_v58, %v4008_v37  ;;  %v1379_v18 = vmul.f32 %v3767_v36, %v4419_v44  ;;  %v1623_v20 = vmul.f32 %v3769_v2, %v4419_v44  ;;  %v4664_v37 = vld [vmem:[%s5694_s1 + $0x8] ss:$0 sm:$0xff] }
 0x351   : > { %v1842_v49 = vadd.f32 %v1765_v6, %v1598_v26  ;;  %v925_v60 = vrot.slane %v821_v62, 1  ;;  %v1170_v31 = vrot.slane %v1066_v28, 2  ;;  %2964 = vmatmul.mubr.msk.f32.gmra.mrb[4].mxu1 %vm252_vm0, %v2397_v59  ;;  %v2077_v30 = vsel %vm906_vm4, %v2075_v57, %v5762_v52 }
 0x352   : > { %v1482_v16 = vrot.slane %v1379_v18, 1  ;;  %v1935_v33 = vmul.f32 %v3773_v41, %v4639_v29  ;;  %v2179_v26 = vmul.f32 %v4664_v37, %v4639_v29  ;;  %v2321_v62 = vsel %vm1151_vm5, %v2319_v11, %v5764_v32 }
 0x353   : > { %v1910_v9 = vadd.f32 %v1878_v55, %v1842_v49  ;;  %v926_v57 = vsel %vm906_vm4, %v923_v1, %v925_v60  ;;  %v1726_v28 = vrot.slane %v1623_v20, 2  ;;  %v1307_v6 = vmul.f32 %v3765_v21, %v4244_v40  ;;  %v5853_v60 = vld [vmem:[#allocation11_spill] sm:$0xff] }
 0x354   : > { %v1026_v59 = vadd.f32 %v926_v57, %v749_v12  ;;  %v1863_v18 = vmul.f32 %v3771_v25, %v4468_v50  ;;  %v2038_v52 = vrot.slane %v1935_v33, 1  ;;  %v5851_v55 = vrot.slane %v4482_v3, 2  ;;  %v5854_v33 = vld [vmem:[#allocation12_spill] sm:$0xff] }
 0x355   : > { %v2154_v51 = vadd.f32 %v2077_v30, %v1910_v9  ;;  %v5852_v11 = vrot.slane %v4491_v8, 1  ;;  %v2282_v32 = vrot.slane %v2179_v26, 2  ;;  %v1727_v12 = vsel %vm1151_vm5, %v1724_v35, %v1726_v28 }
 0x356   : > { %v1171_v49 = vsel %vm1151_vm5, %v5851_v55, %v1170_v31  ;;  %v4689_v20 = vmul.f32 %v3757_v46, %v5853_v60  ;;  %v4693_v30 = vmul.f32 %v3757_v46, %v5854_v33  ;;  %v822_v8 = vmul.f32 %v3761_v45, %v4240_v13 }
 0x357   : > { %v1483_v22 = vsel %vm906_vm4, %v5852_v11, %v1482_v16  ;;  %v1271_v1 = vadd.f32 %v1171_v49, %v1026_v59  ;;  %v2398_v3 = vadd.f32 %v2321_v62, %v2154_v51  ;;  %v4699_v31 = vmul.f32 %v3761_v45, %v4244_v40 }
 0x358   : > { %v1067_v27 = vmul.f32 %v3763_v34, %v4240_v13  ;;  %v2039_v16 = vsel %vm906_vm4, %v2036_v48, %v2038_v52  ;;  %v4708_v26 = vmul.f32 %v3763_v34, %v4244_v40  ;;  %v1380_v51 = vmul.f32 %v3767_v36, %v4464_v38 }
 0x359   : > { %v1339_v35 = vadd.f32 %v1307_v6, %v1271_v1  ;;  %2966 = vmatprep.mubr.msk.f32.mxu1 %vm252_vm0, %v2398_v3  ;;  %v927_v9 = vrot.slane %v822_v8, 1  ;;  %v928_v62 = vrot.slane %v4699_v31, 1  ;;  %v4716_v28 = vmul.f32 %v3767_v36, %v4468_v50 }
 0x35a   : > { %v1172_v57 = vrot.slane %v1067_v27, 2  ;;  %v750_v48 = vmul.f32 %v3759_v58, %v4240_v13  ;;  %v1173_v52 = vrot.slane %v4708_v26, 2  ;;  %v1624_v59 = vmul.f32 %v3769_v2, %v4464_v38 }
 0x35b   : > { %v1583_v5 = vadd.f32 %v1483_v22, %v1339_v35  ;;  %v929_v6 = vsel %vm906_vm4, %v927_v9, %v928_v62  ;;  %v1308_v55 = vmul.f32 %v3765_v21, %v4464_v38  ;;  %v1484_v49 = vrot.slane %v1380_v51, 1 }
 0x35c   : > { %v4730_v11 = vmul.f32 %v3769_v2, %v4468_v50  ;;  %v1027_v1 = vadd.f32 %v929_v6, %v750_v48  ;;  %v1485_v13 = vrot.slane %v4716_v28, 1  ;;  %v1728_v60 = vrot.slane %v1624_v59, 2 }
 0x35d   : > { %v1827_v22 = vadd.f32 %v1727_v12, %v1583_v5  ;;  %v1174_v33 = vsel %vm1151_vm5, %v1172_v57, %v1173_v52  ;;  %v1936_v8 = vmul.f32 %v3773_v41, %v4689_v20  ;;  %v4741_v27 = vmul.f32 %v3773_v41, %v4693_v30 }
 0x35e   : > { %v1729_v3 = vrot.slane %v4730_v11, 2  ;;  %v1272_v51 = vadd.f32 %v1174_v33, %v1027_v1  ;;  %v2180_v12 = vmul.f32 %v4664_v37, %v4689_v20  ;;  %v4747_v9 = vmul.f32 %v4664_v37, %v4693_v30 }
 0x35f   : > { %v1895_v35 = vadd.f32 %v1863_v18, %v1827_v22  ;;  %v2283_v57 = vsel %vm1151_vm5, %v2280_v7, %v2282_v32  ;;  %v1864_v5 = vmul.f32 %v3771_v25, %v4689_v20  ;;  %v2040_v48 = vrot.slane %v1936_v8, 1 }
 0x360   : > { %v5765_v59 = vrot.slane %v4741_v27, 1  ;;  %v1340_v18 = vadd.f32 %v1308_v55, %v1272_v51  ;;  %v1486_v22 = vsel %vm906_vm4, %v1484_v49, %v1485_v13  ;;  %v1730_v1 = vsel %vm1151_vm5, %v1728_v60, %v1729_v3 }
 0x361   : > { %v2139_v6 = vadd.f32 %v2039_v16, %v1895_v35  ;;  %v2284_v33 = vrot.slane %v2180_v12, 2  ;;  %v5766_v53 = vrot.slane %v4747_v9, 2  ;;  %v845_v7 = vmul.f32 %v3761_v45, %v4309_v4 }
 0x362   : > { %v1090_v32 = vmul.f32 %v3763_v34, %v4309_v4  ;;  %v1584_v16 = vadd.f32 %v1486_v22, %v1340_v18  ;;  %v765_v55 = vmul.f32 %v3759_v58, %v3801_v17  ;;  %v1403_v49 = vmul.f32 %v3767_v36, %v5844_v14  ;;  %v5855_v17 = vld [vmem:[#allocation18_spill] sm:$0xff] }
 0x363   : > { %v2383_v8 = vadd.f32 %v2283_v57, %v2139_v6  ;;  %v2042_v60 = vsel %vm906_vm4, %v2040_v48, %v5765_v59  ;;  %v965_v35 = vrot.slane %v845_v7, 1  ;;  %v1647_v12 = vmul.f32 %v3769_v2, %v5844_v14 }
 0x364   : > { %v1210_v51 = vrot.slane %v1090_v32, 2  ;;  %v1828_v4 = vadd.f32 %v1730_v1, %v1584_v16  ;;  %v1323_v57 = vmul.f32 %v3765_v21, %v5835_v56  ;;  %v1522_v6 = vrot.slane %v1403_v49, 1 }
 0x365   : > { %2943 = vmatmul.mubr.msk.f32.gmra.mrb[6].mxu0 %vm252_vm0, %v2383_v8  ;;  %v1959_v18 = vmul.f32 %v3773_v41, %v5855_v17  ;;  %v2286_v22 = vsel %vm1151_vm5, %v2284_v33, %v5766_v53  ;;  %v966_v48 = vsel %vm906_vm4, %v963_v43, %v965_v35  ;;  %v1766_v7 = vrot.slane %v1647_v12, 2 }
 0x366   : > { %v1879_v32 = vmul.f32 %v3771_v25, %v5849_v63  ;;  %v1896_v1 = vadd.f32 %v1864_v5, %v1828_v4  ;;  %v1042_v8 = vadd.f32 %v966_v48, %v765_v55  ;;  %v5856_v16 = vrot.slane %v4584_v15, 2 }
 0x367   : > { %v2203_v59 = vmul.f32 %v4664_v37, %v5855_v17  ;;  %v1523_v33 = vsel %vm906_vm4, %v1520_v24, %v1522_v6  ;;  %v766_v61 = vmul.f32 %v3759_v58, %v3805_v0  ;;  %v846_v43 = vmul.f32 %v3761_v45, %v3805_v0 }
 0x368   : > { %v1211_v49 = vsel %vm1151_vm5, %v5856_v16, %v1210_v51  ;;  %v4802_v5 = vmul.f32 %v3761_v45, %v5835_v56  ;;  %v2140_v15 = vadd.f32 %v2042_v60, %v1896_v1  ;;  %v2078_v35 = vrot.slane %v1959_v18, 1 }
 0x369   : > { %v1287_v55 = vadd.f32 %v1211_v49, %v1042_v8  ;;  %v1091_v51 = vmul.f32 %v3763_v34, %v3805_v0  ;;  %v5857_v42 = vrot.slane %v4604_v54, 2  ;;  %v967_v12 = vrot.slane %v846_v43, 1 }
 0x36a   : > { %v968_v4 = vrot.slane %v4802_v5, 1  ;;  %v4812_v6 = vmul.f32 %v3763_v34, %v5835_v56  ;;  %v2384_v48 = vadd.f32 %v2286_v22, %v2140_v15  ;;  %v2322_v53 = vrot.slane %v2203_v59, 2 }
 0x36b   : > { %v1767_v24 = vsel %vm1151_vm5, %v5857_v42, %v1766_v7  ;;  %v1355_v16 = vadd.f32 %v1323_v57, %v1287_v55  ;;  %v1212_v60 = vrot.slane %v1091_v51, 2  ;;  %v1404_v54 = vmul.f32 %v3767_v36, %v5848_v23 }
 0x36c   : > { %v969_v18 = vsel %vm906_vm4, %v967_v12, %v968_v4  ;;  %v5767_v0 = vrot.slane %v4812_v6, 2  ;;  %v4822_v7 = vmul.f32 %v3767_v36, %v5849_v63  ;;  %2945 = vmatprep.mubr.msk.f32.mxu0 %vm252_vm0, %v2384_v48  ;;  %v1648_v59 = vmul.f32 %v3769_v2, %v5848_v23  ;;  %v5859_v48 = vld [vmem:[#allocation19_spill] sm:$0xff] }
 0x36d   : > { %v1599_v1 = vadd.f32 %v1523_v33, %v1355_v16  ;;  %v1043_v22 = vadd.f32 %v969_v18, %v766_v61  ;;  %v4829_v57 = vmul.f32 %v3769_v2, %v5849_v63  ;;  %v1324_v49 = vmul.f32 %v3765_v21, %v5848_v23  ;;  %v5860_v18 = vld [vmem:[#allocation21_spill] sm:$0xff] }
 0x36e   : > { %v1214_v8 = vsel %vm1151_vm5, %v1212_v60, %v5767_v0  ;;  %v1524_v43 = vrot.slane %v1404_v54, 1  ;;  %v5768_v15 = vrot.slane %v4822_v7, 1  ;;  %v1768_v61 = vrot.slane %v1648_v59, 2 }
 0x36f   : > { %v1843_v55 = vadd.f32 %v1767_v24, %v1599_v1  ;;  %v1288_v33 = vadd.f32 %v1214_v8, %v1043_v22  ;;  %v1769_v51 = vrot.slane %v4829_v57, 2  ;;  %v5858_v42 = vrot.slane %v4622_v19, 1 }
 0x370   : > { %v1960_v16 = vmul.f32 %v3773_v41, %v5859_v48  ;;  %v4845_v60 = vmul.f32 %v3773_v41, %v5860_v18  ;;  %v2204_v54 = vmul.f32 %v4664_v37, %v5859_v48  ;;  %v5861_v24 = vrot.slane %v4629_v10, 2 }
 0x371   : > { %v2079_v12 = vsel %vm906_vm4, %v5858_v42, %v2078_v35  ;;  %v1911_v0 = vadd.f32 %v1879_v32, %v1843_v55  ;;  %v1356_v22 = vadd.f32 %v1324_v49, %v1288_v33  ;;  %v4854_v19 = vmul.f32 %v4664_v37, %v5860_v18 }
 0x372   : > { %v2323_v1 = vsel %vm1151_vm5, %v5861_v24, %v2322_v53  ;;  %v1526_v35 = vsel %vm906_vm4, %v1524_v43, %v5768_v15  ;;  %v1880_v59 = vmul.f32 %v3771_v25, %v5859_v48  ;;  %v2080_v8 = vrot.slane %v1960_v16, 1  ;;  %v5862_v53 = vld [vmem:[#allocation13_spill] sm:$0xff] }
 0x373   : > { %v2081_v42 = vrot.slane %v4845_v60, 1  ;;  %v2155_v32 = vadd.f32 %v2079_v12, %v1911_v0  ;;  %v1600_v55 = vadd.f32 %v1526_v35, %v1356_v22  ;;  %v1770_v10 = vsel %vm1151_vm5, %v1768_v61, %v1769_v51 }
 0x374   : > { %v4867_v49 = vmul.f32 %v3757_v46, %v5862_v53  ;;  %v2324_v33 = vrot.slane %v2204_v54, 2  ;;  %v2325_v24 = vrot.slane %v4854_v19, 2  ;;  %v824_v43 = vmul.f32 %v3761_v45, %v4419_v44 }
 0x375   : > { %v1069_v16 = vmul.f32 %v3763_v34, %v4419_v44  ;;  %v2399_v15 = vadd.f32 %v2323_v1, %v2155_v32  ;;  %v1844_v0 = vadd.f32 %v1770_v10, %v1600_v55  ;;  %v751_v12 = vmul.f32 %v3759_v58, %v4244_v40 }
 0x376   : > { %v1382_v61 = vmul.f32 %v3767_v36, %v4639_v29  ;;  %v2082_v54 = vsel %vm906_vm4, %v2080_v8, %v2081_v42  ;;  %v930_v22 = vrot.slane %v824_v43, 1  ;;  %v1626_v53 = vmul.f32 %v3769_v2, %v4639_v29 }
 0x377   : > { %v1175_v35 = vrot.slane %v1069_v16, 2  ;;  %2967 = vmatmul.mubr.msk.f32.gmra.mrb[6].mxu1 %vm252_vm0, %v2399_v15  ;;  %v1912_v44 = vadd.f32 %v1880_v59, %v1844_v0  ;;  %v1938_v32 = vmul.f32 %v3773_v41, %v4867_v49  ;;  %v2182_v40 = vmul.f32 %v4664_v37, %v4867_v49 }
 0x378   : > { %v1487_v1 = vrot.slane %v1382_v61, 1  ;;  %v2326_v55 = vsel %vm1151_vm5, %v2324_v33, %v2325_v24  ;;  %v931_v8 = vsel %vm906_vm4, %v928_v62, %v930_v22  ;;  %v1309_v10 = vmul.f32 %v3765_v21, %v4468_v50  ;;  %v5863_v61 = vld [vmem:[#allocation14_spill] sm:$0xff] }
 0x379   : > { %v1731_v15 = vrot.slane %v1626_v53, 2  ;;  %v2156_v59 = vadd.f32 %v2082_v54, %v1912_v44  ;;  %v1028_v43 = vadd.f32 %v931_v8, %v751_v12  ;;  %v1176_v16 = vsel %vm1151_vm5, %v1173_v52, %v1175_v35  ;;  %v5864_v35 = vld [vmem:[#allocation15_spill] sm:$0xff] }
 0x37a   : > { %v1865_v0 = vmul.f32 %v3771_v25, %v4693_v30  ;;  %v1488_v33 = vsel %vm906_vm4, %v1485_v13, %v1487_v1  ;;  %v2043_v62 = vrot.slane %v1938_v32, 1  ;;  %v4909_v54 = vmul.f32 %v3757_v46, %v5863_v61 }
 0x37b   : > { %v1732_v31 = vsel %vm1151_vm5, %v1729_v3, %v1731_v15  ;;  %v2400_v12 = vadd.f32 %v2326_v55, %v2156_v59  ;;  %v1273_v26 = vadd.f32 %v1176_v16, %v1028_v43  ;;  %v2287_v22 = vrot.slane %v2182_v40, 2 }
 0x37c   : > { %v825_v52 = vmul.f32 %v3761_v45, %v4464_v38  ;;  %v4915_v28 = vmul.f32 %v3757_v46, %v5864_v35  ;;  %v4919_v11 = vmul.f32 %v3761_v45, %v4468_v50  ;;  %v1070_v13 = vmul.f32 %v3763_v34, %v4464_v38 }
 0x37d   : > { %v4925_v3 = vmul.f32 %v3763_v34, %v4468_v50  ;;  %2969 = vmatprep.mubr.msk.f32.mxu1 %vm252_vm0, %v2400_v12  ;;  %v1341_v53 = vadd.f32 %v1309_v10, %v1273_v26  ;;  %v752_v44 = vmul.f32 %v3759_v58, %v4464_v38  ;;  %v1383_v32 = vmul.f32 %v3767_v36, %v4689_v20 }
 0x37e   : > { %v932_v1 = vrot.slane %v825_v52, 1  ;;  %v5771_v40 = vrot.slane %v4919_v11, 1  ;;  %v1177_v55 = vrot.slane %v1070_v13, 2  ;;  %v4936_v15 = vmul.f32 %v3767_v36, %v4693_v30 }
 0x37f   : > { %v5769_v8 = vrot.slane %v4925_v3, 2  ;;  %v1585_v59 = vadd.f32 %v1488_v33, %v1341_v53  ;;  %v5865_v43 = vrot.slane %v4741_v27, 1  ;;  %v1627_v38 = vmul.f32 %v3769_v2, %v4689_v20 }
 0x380   : > { %v4945_v16 = vmul.f32 %v3769_v2, %v4693_v30  ;;  %v5866_v61 = vrot.slane %v4747_v9, 2  ;;  %v934_v26 = vsel %vm906_vm4, %v932_v1, %v5771_v40  ;;  %v1489_v33 = vrot.slane %v1383_v32, 1 }
 0x381   : > { %v2044_v10 = vsel %vm906_vm4, %v5865_v43, %v2043_v62  ;;  %v5770_v27 = vrot.slane %v4936_v15, 1  ;;  %v1829_v52 = vadd.f32 %v1732_v31, %v1585_v59  ;;  %v1029_v62 = vadd.f32 %v934_v26, %v752_v44 }
 0x382   : > { %v2288_v12 = vsel %vm1151_vm5, %v5866_v61, %v2287_v22  ;;  %v1733_v35 = vrot.slane %v1627_v38, 2  ;;  %v1734_v13 = vrot.slane %v4945_v16, 2  ;;  %v1179_v53 = vsel %vm1151_vm5, %v1177_v55, %v5769_v8 }
 0x383   : > { %v1939_v9 = vmul.f32 %v3773_v41, %v4909_v54  ;;  %v4962_v22 = vmul.f32 %v3773_v41, %v4915_v28  ;;  %v2183_v1 = vmul.f32 %v4664_v37, %v4909_v54  ;;  %v1897_v32 = vadd.f32 %v1865_v0, %v1829_v52 }
 0x384   : > { %v1274_v31 = vadd.f32 %v1179_v53, %v1029_v62  ;;  %v1310_v44 = vmul.f32 %v3765_v21, %v4689_v20  ;;  %v4970_v59 = vmul.f32 %v4664_v37, %v4915_v28  ;;  %v1491_v55 = vsel %vm906_vm4, %v1489_v33, %v5770_v27 }
 0x385   : > { %v1866_v43 = vmul.f32 %v3771_v25, %v4909_v54  ;;  %v2045_v38 = vrot.slane %v1939_v9, 1  ;;  %v5772_v61 = vrot.slane %v4962_v22, 1  ;;  %v2141_v26 = vadd.f32 %v2044_v10, %v1897_v32 }
 0x386   : > { %v1342_v0 = vadd.f32 %v1310_v44, %v1274_v31  ;;  %v1735_v52 = vsel %vm1151_vm5, %v1733_v35, %v1734_v13  ;;  %v848_v62 = vmul.f32 %v3761_v45, %v5844_v14  ;;  %v2289_v53 = vrot.slane %v2183_v1, 2 }
 0x387   : > { %v2290_v8 = vrot.slane %v4970_v59, 2  ;;  %v1093_v33 = vmul.f32 %v3763_v34, %v5844_v14  ;;  %v1406_v9 = vmul.f32 %v3767_v36, %v5855_v17  ;;  %v2385_v27 = vadd.f32 %v2288_v12, %v2141_v26 }
 0x388   : > { %v1586_v40 = vadd.f32 %v1491_v55, %v1342_v0  ;;  %v767_v10 = vmul.f32 %v3759_v58, %v5835_v56  ;;  %v970_v32 = vrot.slane %v848_v62, 1  ;;  %v2047_v35 = vsel %vm906_vm4, %v2045_v38, %v5772_v61  ;;  %v5867_v55 = vld [vmem:[#allocation22_spill] sm:$0xff] }
 0x389   : > { %v1215_v31 = vrot.slane %v1093_v33, 2  ;;  %v1527_v1 = vrot.slane %v1406_v9, 1  ;;  %v1650_v44 = vmul.f32 %v3769_v2, %v5855_v17  ;;  %2946 = vmatmul.mubr.msk.f32.gmra.mrb[8].mxu0 %vm252_vm0, %v2385_v27  ;;  %v1962_v56 = vmul.f32 %v3773_v41, %v5867_v55 }
 0x38a   : > { %v1830_v14 = vadd.f32 %v1735_v52, %v1586_v40  ;;  %v971_v12 = vsel %vm906_vm4, %v968_v4, %v970_v32  ;;  %v2206_v26 = vmul.f32 %v4664_v37, %v5867_v55  ;;  %v2291_v38 = vsel %vm1151_vm5, %v2289_v53, %v2290_v8 }
 0x38b   : > { %v1044_v0 = vadd.f32 %v971_v12, %v767_v10  ;;  %v1325_v62 = vmul.f32 %v3765_v21, %v5849_v63  ;;  %v1881_v40 = vmul.f32 %v3771_v25, %v5860_v18  ;;  %v5868_v4 = vrot.slane %v4812_v6, 2 }
 0x38c   : > { %v1898_v5 = vadd.f32 %v1866_v43, %v1830_v14  ;;  %v5869_v52 = vrot.slane %v4822_v7, 1  ;;  %v1771_v9 = vrot.slane %v1650_v44, 2  ;;  %v2083_v61 = vrot.slane %v1962_v56, 1 }
 0x38d   : > { %v1216_v27 = vsel %vm1151_vm5, %v5868_v4, %v1215_v31  ;;  %v849_v53 = vmul.f32 %v3761_v45, %v5848_v23  ;;  %v5020_v10 = vmul.f32 %v3761_v45, %v5849_v63  ;;  %v2327_v43 = vrot.slane %v2206_v26, 2 }
 0x38e   : > { %v1528_v33 = vsel %vm906_vm4, %v5869_v52, %v1527_v1  ;;  %v1289_v32 = vadd.f32 %v1216_v27, %v1044_v0  ;;  %v2142_v12 = vadd.f32 %v2047_v35, %v1898_v5  ;;  %v768_v6 = vmul.f32 %v3759_v58, %v5848_v23 }
 0x38f   : > { %v1094_v7 = vmul.f32 %v3763_v34, %v5848_v23  ;;  %v972_v1 = vrot.slane %v849_v53, 1  ;;  %v973_v44 = vrot.slane %v5020_v10, 1  ;;  %v5029_v14 = vmul.f32 %v3763_v34, %v5849_v63 }
 0x390   : > { %v1357_v31 = vadd.f32 %v1325_v62, %v1289_v32  ;;  %v2386_v56 = vadd.f32 %v2291_v38, %v2142_v12  ;;  %v1772_v35 = vsel %vm1151_vm5, %v1769_v51, %v1771_v9  ;;  %v1407_v0 = vmul.f32 %v3767_v36, %v5859_v48 }
 0x391   : > { %v1217_v26 = vrot.slane %v1094_v7, 2  ;;  %v974_v23 = vsel %vm906_vm4, %v972_v1, %v973_v44  ;;  %v1218_v62 = vrot.slane %v5029_v14, 2  ;;  %v5042_v4 = vmul.f32 %v3767_v36, %v5860_v18  ;;  %v5870_v7 = vld [vmem:[#allocation23_spill] sm:$0xff] }
 0x392   : > { %v1601_v5 = vadd.f32 %v1528_v33, %v1357_v31  ;;  %2948 = vmatprep.mubr.msk.f32.mxu0 %vm252_vm0, %v2386_v56  ;;  %v1045_v57 = vadd.f32 %v974_v23, %v768_v6  ;;  %v1529_v38 = vrot.slane %v1407_v0, 1  ;;  %v1651_v51 = vmul.f32 %v3769_v2, %v5859_v48 }
 0x393   : > { %v5049_v27 = vmul.f32 %v3769_v2, %v5860_v18  ;;  %v1219_v33 = vsel %vm1151_vm5, %v1217_v26, %v1218_v62  ;;  %v1326_v9 = vmul.f32 %v3765_v21, %v5859_v48  ;;  %v1530_v32 = vrot.slane %v5042_v4, 1 }
 0x394   : > { %v1845_v52 = vadd.f32 %v1772_v35, %v1601_v5  ;;  %v1290_v53 = vadd.f32 %v1219_v33, %v1045_v57  ;;  %v1773_v12 = vrot.slane %v1651_v51, 2  ;;  %v1963_v31 = vmul.f32 %v3773_v41, %v5870_v7  ;;  %v5871_v35 = vld [vmem:[#allocation24_spill] sm:$0xff] }
 0x395   : > { %v1774_v6 = vrot.slane %v5049_v27, 2  ;;  %v2084_v56 = vsel %vm906_vm4, %v2081_v42, %v2083_v61  ;;  %v5065_v26 = vmul.f32 %v3773_v41, %v5871_v35  ;;  %v2207_v0 = vmul.f32 %v4664_v37, %v5870_v7  ;;  %v5872_v51 = vld [vmem:[#allocation16_spill] sm:$0xff] }
 0x396   : > { %v1913_v1 = vadd.f32 %v1881_v40, %v1845_v52  ;;  %v2328_v5 = vsel %vm1151_vm5, %v2325_v24, %v2327_v43  ;;  %v1358_v23 = vadd.f32 %v1326_v9, %v1290_v53  ;;  %v1531_v40 = vsel %vm906_vm4, %v1529_v38, %v1530_v32 }
 0x397   : > { %v5077_v60 = vmul.f32 %v4664_v37, %v5871_v35  ;;  %v2085_v61 = vrot.slane %v1963_v31, 1  ;;  %v5773_v57 = vrot.slane %v5065_v26, 1  ;;  %v5082_v52 = vmul.f32 %v3757_v46, %v5872_v51 }
 0x398   : > { %v2157_v42 = vadd.f32 %v2084_v56, %v1913_v1  ;;  %v1602_v19 = vadd.f32 %v1531_v40, %v1358_v23  ;;  %v1775_v24 = vsel %vm1151_vm5, %v1773_v12, %v1774_v6  ;;  %v1882_v43 = vmul.f32 %v3771_v25, %v5870_v7 }
 0x399   : > { %v827_v38 = vmul.f32 %v3761_v45, %v4639_v29  ;;  %v2329_v9 = vrot.slane %v2207_v0, 2  ;;  %v2330_v53 = vrot.slane %v5077_v60, 2  ;;  %v1072_v31 = vmul.f32 %v3763_v34, %v4639_v29 }
 0x39a   : > { %v2401_v33 = vadd.f32 %v2328_v5, %v2157_v42  ;;  %v1846_v46 = vadd.f32 %v1775_v24, %v1602_v19  ;;  %v753_v1 = vmul.f32 %v3759_v58, %v4468_v50  ;;  %v1385_v12 = vmul.f32 %v3767_v36, %v4867_v49 }
 0x39b   : > { %v935_v56 = vrot.slane %v827_v38, 1  ;;  %v2087_v5 = vsel %vm906_vm4, %v2085_v61, %v5773_v57  ;;  %v1180_v0 = vrot.slane %v1072_v31, 2  ;;  %v1629_v23 = vmul.f32 %v3769_v2, %v4867_v49 }
 0x39c   : > { %2970 = vmatmul.mubr.msk.f32.gmra.mrb[8].mxu1 %vm252_vm0, %v2401_v33  ;;  %v1941_v29 = vmul.f32 %v3773_v41, %v5082_v52  ;;  %v1914_v40 = vadd.f32 %v1882_v43, %v1846_v46  ;;  %v5873_v50 = vrot.slane %v4919_v11, 1  ;;  %v1492_v51 = vrot.slane %v1385_v12, 1 }
 0x39d   : > { %v2185_v19 = vmul.f32 %v4664_v37, %v5082_v52  ;;  %v2331_v61 = vsel %vm1151_vm5, %v2329_v9, %v2330_v53  ;;  %v1311_v38 = vmul.f32 %v3765_v21, %v4693_v30  ;;  %v1736_v33 = vrot.slane %v1629_v23, 2 }
 0x39e   : > { %v936_v42 = vsel %vm906_vm4, %v5873_v50, %v935_v56  ;;  %v2158_v31 = vadd.f32 %v2087_v5, %v1914_v40  ;;  %v5874_v43 = vrot.slane %v4925_v3, 2  ;;  %v1867_v46 = vmul.f32 %v3771_v25, %v4915_v28 }
 0x39f   : > { %v1030_v24 = vadd.f32 %v936_v42, %v753_v1  ;;  %v2048_v56 = vrot.slane %v1941_v29, 1  ;;  %v5875_v50 = vrot.slane %v4936_v15, 1  ;;  %v2292_v9 = vrot.slane %v2185_v19, 2 }
 0x3a0   : > { %v1181_v11 = vsel %vm1151_vm5, %v5874_v43, %v1180_v0  ;;  %v828_v1 = vmul.f32 %v3761_v45, %v4689_v20  ;;  %v2402_v42 = vadd.f32 %v2331_v61, %v2158_v31  ;;  %v754_v5 = vmul.f32 %v3759_v58, %v4689_v20 }
 0x3a1   : > { %v1275_v12 = vadd.f32 %v1181_v11, %v1030_v24  ;;  %v1493_v57 = vsel %vm906_vm4, %v5875_v50, %v1492_v51  ;;  %v5130_v3 = vmul.f32 %v3761_v45, %v4693_v30  ;;  %v1073_v0 = vmul.f32 %v3763_v34, %v4689_v20 }
 0x3a2   : > { %v1737_v15 = vsel %vm1151_vm5, %v1734_v13, %v1736_v33  ;;  %v937_v29 = vrot.slane %v828_v1, 1  ;;  %v5139_v40 = vmul.f32 %v3763_v34, %v4693_v30  ;;  %2972 = vmatprep.mubr.msk.f32.mxu1 %vm252_vm0, %v2402_v42  ;;  %v1386_v61 = vmul.f32 %v3767_v36, %v4909_v54 }
 0x3a3   : > { %v1343_v23 = vadd.f32 %v1311_v38, %v1275_v12  ;;  %v5774_v51 = vrot.slane %v5130_v3, 1  ;;  %v1182_v19 = vrot.slane %v1073_v0, 2  ;;  %v5147_v20 = vmul.f32 %v3767_v36, %v4915_v28 }
 0x3a4   : > { %v5775_v13 = vrot.slane %v5139_v40, 2  ;;  %v1630_v24 = vmul.f32 %v3769_v2, %v4909_v54  ;;  %v5154_v38 = vmul.f32 %v3769_v2, %v4915_v28  ;;  %v5876_v33 = vrot.slane %v4962_v22, 1 }
 0x3a5   : > { %v1587_v16 = vadd.f32 %v1493_v57, %v1343_v23  ;;  %v939_v43 = vsel %vm906_vm4, %v937_v29, %v5774_v51  ;;  %v1312_v57 = vmul.f32 %v3765_v21, %v4909_v54  ;;  %v1494_v11 = vrot.slane %v1386_v61, 1 }
 0x3a6   : > { %v2049_v31 = vsel %vm906_vm4, %v5876_v33, %v2048_v56  ;;  %v1031_v50 = vadd.f32 %v939_v43, %v754_v5  ;;  %v1495_v1 = vrot.slane %v5147_v20, 1  ;;  %v1738_v42 = vrot.slane %v1630_v24, 2  ;;  %v5877_v56 = vld [vmem:[#allocation28_spill] sm:$0xff]  ;;  %v5878_v33 = vld [vmem:[#allocation2_spill] sm:$0xff] }
 0x3a7   : > { %v1831_v12 = vadd.f32 %v1737_v15, %v1587_v16  ;;  %v1184_v0 = vsel %vm1151_vm5, %v1182_v19, %v5775_v13  ;;  %v1739_v22 = vrot.slane %v5154_v38, 2  ;;  %v1942_v23 = vmul.f32 %v3773_v41, %v5877_v56 }
 0x3a8   : > { %v5173_v29 = vmul.f32 %v3773_v41, %v5878_v33  ;;  %v1276_v61 = vadd.f32 %v1184_v0, %v1031_v50  ;;  %v2186_v5 = vmul.f32 %v4664_v37, %v5877_v56  ;;  %v5179_v15 = vmul.f32 %v4664_v37, %v5878_v33 }
 0x3a9   : > { %v1899_v51 = vadd.f32 %v1867_v46, %v1831_v12  ;;  %v2293_v19 = vsel %vm1151_vm5, %v2290_v8, %v2292_v9  ;;  %v1868_v16 = vmul.f32 %v3771_v25, %v5877_v56  ;;  %v2050_v24 = vrot.slane %v1942_v23, 1 }
 0x3aa   : > { %v2051_v43 = vrot.slane %v5173_v29, 1  ;;  %v1344_v46 = vadd.f32 %v1312_v57, %v1276_v61  ;;  %v1496_v12 = vsel %vm906_vm4, %v1494_v11, %v1495_v1  ;;  %v1740_v50 = vsel %vm1151_vm5, %v1738_v42, %v1739_v22 }
 0x3ab   : > { %v2143_v13 = vadd.f32 %v2049_v31, %v1899_v51  ;;  %v2294_v0 = vrot.slane %v2186_v5, 2  ;;  %v2295_v59 = vrot.slane %v5179_v15, 2  ;;  %v851_v8 = vmul.f32 %v3761_v45, %v5855_v17 }
 0x3ac   : > { %v1096_v9 = vmul.f32 %v3763_v34, %v5855_v17  ;;  %v1588_v51 = vadd.f32 %v1496_v12, %v1344_v46  ;;  %v769_v31 = vmul.f32 %v3759_v58, %v5849_v63  ;;  %v1409_v57 = vmul.f32 %v3767_v36, %v5867_v55  ;;  %v5879_v63 = vld [vmem:[#allocation25_spill] sm:$0xff] }
 0x3ad   : > { %v2387_v23 = vadd.f32 %v2293_v19, %v2143_v13  ;;  %v2052_v11 = vsel %vm906_vm4, %v2050_v24, %v2051_v43  ;;  %v975_v42 = vrot.slane %v851_v8, 1  ;;  %v1653_v5 = vmul.f32 %v3769_v2, %v5867_v55 }
 0x3ae   : > { %v1220_v61 = vrot.slane %v1096_v9, 2  ;;  %v1832_v17 = vadd.f32 %v1740_v50, %v1588_v51  ;;  %v1327_v13 = vmul.f32 %v3765_v21, %v5860_v18  ;;  %v1532_v19 = vrot.slane %v1409_v57, 1 }
 0x3af   : > { %2949 = vmatmul.mubr.msk.f32.gmra.mrb[10].mxu0 %vm252_vm0, %v2387_v23  ;;  %v1965_v46 = vmul.f32 %v3773_v41, %v5879_v63  ;;  %v2296_v12 = vsel %vm1151_vm5, %v2294_v0, %v2295_v59  ;;  %v976_v24 = vsel %vm906_vm4, %v973_v44, %v975_v42  ;;  %v1776_v8 = vrot.slane %v1653_v5, 2 }
 0x3b0   : > { %v1883_v9 = vmul.f32 %v3771_v25, %v5871_v35  ;;  %v1900_v50 = vadd.f32 %v1868_v16, %v1832_v17  ;;  %v1046_v23 = vadd.f32 %v976_v24, %v769_v31  ;;  %v1221_v51 = vsel %vm1151_vm5, %v1218_v62, %v1220_v61 }
 0x3b1   : > { %v2209_v57 = vmul.f32 %v4664_v37, %v5879_v63  ;;  %v1533_v0 = vsel %vm906_vm4, %v1530_v32, %v1532_v19  ;;  %v770_v10 = vmul.f32 %v3759_v58, %v5859_v48  ;;  %v852_v44 = vmul.f32 %v3761_v45, %v5859_v48 }
 0x3b2   : > { %v5234_v16 = vmul.f32 %v3761_v45, %v5860_v18  ;;  %v2144_v14 = vadd.f32 %v2052_v11, %v1900_v50  ;;  %v1291_v31 = vadd.f32 %v1221_v51, %v1046_v23  ;;  %v2088_v62 = vrot.slane %v1965_v46, 1 }
 0x3b3   : > { %v1097_v42 = vmul.f32 %v3763_v34, %v5859_v48  ;;  %v1777_v4 = vsel %vm1151_vm5, %v1774_v6, %v1776_v8  ;;  %v977_v32 = vrot.slane %v852_v44, 1  ;;  %v5244_v5 = vmul.f32 %v3763_v34, %v5860_v18 }
 0x3b4   : > { %v5777_v61 = vrot.slane %v5234_v16, 1  ;;  %v2388_v17 = vadd.f32 %v2296_v12, %v2144_v14  ;;  %v1359_v19 = vadd.f32 %v1327_v13, %v1291_v31  ;;  %v2332_v24 = vrot.slane %v2209_v57, 2 }
 0x3b5   : > { %v1222_v11 = vrot.slane %v1097_v42, 2  ;;  %v5776_v48 = vrot.slane %v5244_v5, 2  ;;  %v1410_v27 = vmul.f32 %v3767_v36, %v5870_v7  ;;  %v5254_v6 = vmul.f32 %v3767_v36, %v5871_v35  ;;  %v5880_v42 = vld [vmem:[#allocation29_spill] sm:$0xff] }
 0x3b6   : > { %v979_v46 = vsel %vm906_vm4, %v977_v32, %v5777_v61  ;;  %2951 = vmatprep.mubr.msk.f32.mxu0 %vm252_vm0, %v2388_v17  ;;  %v1603_v8 = vadd.f32 %v1533_v0, %v1359_v19  ;;  %v1654_v13 = vmul.f32 %v3769_v2, %v5870_v7  ;;  %v5261_v50 = vmul.f32 %v3769_v2, %v5871_v35  ;;  %v5881_v17 = vld [vmem:[#allocation26_spill] sm:$0xff] }
 0x3b7   : > { %v1047_v12 = vadd.f32 %v979_v46, %v770_v10  ;;  %v1224_v23 = vsel %vm1151_vm5, %v1222_v11, %v5776_v48  ;;  %v1328_v51 = vmul.f32 %v3765_v21, %v5870_v7  ;;  %v1534_v57 = vrot.slane %v1410_v27, 1  ;;  %v5882_v46 = vld [vmem:[#allocation27_spill] sm:$0xff] }
 0x3b8   : > { %v5778_v44 = vrot.slane %v5254_v6, 1  ;;  %v1847_v14 = vadd.f32 %v1777_v4, %v1603_v8  ;;  %v1778_v10 = vrot.slane %v1654_v13, 2  ;;  %v5780_v31 = vrot.slane %v5261_v50, 2 }
 0x3b9   : > { %v1292_v0 = vadd.f32 %v1224_v23, %v1047_v12  ;;  %v5272_v32 = vmul.f32 %v3773_v41, %v5880_v42  ;;  %v1966_v19 = vmul.f32 %v3773_v41, %v5881_v17  ;;  %v5278_v11 = vmul.f32 %v3773_v41, %v5882_v46 }
 0x3ba   : > { %v2210_v27 = vmul.f32 %v4664_v37, %v5881_v17  ;;  %v1915_v48 = vadd.f32 %v1883_v9, %v1847_v14  ;;  %v5883_v4 = vrot.slane %v5065_v26, 1  ;;  %v5287_v13 = vmul.f32 %v4664_v37, %v5882_v46 }
 0x3bb   : > { %v1360_v12 = vadd.f32 %v1328_v51, %v1292_v0  ;;  %v2333_v23 = vsel %vm1151_vm5, %v2330_v53, %v2332_v24  ;;  %v1536_v61 = vsel %vm906_vm4, %v1534_v57, %v5778_v44  ;;  %v1780_v9 = vsel %vm1151_vm5, %v1778_v10, %v5780_v31 }
 0x3bc   : > { %v2089_v8 = vsel %vm906_vm4, %v5883_v4, %v2088_v62  ;;  %v2090_v26 = vrot.slane %v1966_v19, 1  ;;  %v5779_v51 = vrot.slane %v5278_v11, 1  ;;  %v830_v0 = vmul.f32 %v3761_v45, %v4867_v49 }
 0x3bd   : > { %v2159_v14 = vadd.f32 %v2089_v8, %v1915_v48  ;;  %v1604_v62 = vadd.f32 %v1536_v61, %v1360_v12  ;;  %v2334_v4 = vrot.slane %v2210_v27, 2  ;;  %v2335_v60 = vrot.slane %v5287_v13, 2  ;;  %v5312_v12 = vpop.f32.mrb[0].mxu0 }
 0x3be   : > { %v1075_v53 = vmul.f32 %v3763_v34, %v4867_v49  ;;  %v1388_v24 = vmul.f32 %v3767_v36, %v5082_v52  ;;  %v1884_v48 = vmul.f32 %v3771_v25, %v5881_v17  ;;  %v940_v61 = vrot.slane %v830_v0, 1  ;;  %v5322_v0 = vpop.f32.mrb[1].mxu0 }
 0x3bf   : > { %v2403_v57 = vadd.f32 %v2333_v23, %v2159_v14  ;;  %v1848_v44 = vadd.f32 %v1780_v9, %v1604_v62  ;;  %v755_v10 = vmul.f32 %v3759_v58, %v4693_v30  ;;  %v1632_v27 = vmul.f32 %v3769_v2, %v5082_v52  ;;  %v5885_v14 = vld [vmem:[#allocation30_spill] sm:$0xff] }
 0x3c0   : > { %v1185_v19 = vrot.slane %v1075_v53, 2  ;;  %v1497_v8 = vrot.slane %v1388_v24, 1  ;;  %v5884_v23 = vrot.slane %v5130_v3, 1  ;;  %v1944_v62 = vmul.f32 %v3773_v41, %v5885_v14 }
 0x3c1   : > { %2973 = vmatmul.mubr.msk.f32.gmra.mrb[10].mxu1 %vm252_vm0, %v2403_v57  ;;  %v1916_v49 = vadd.f32 %v1884_v48, %v1848_v44  ;;  %v2188_v30 = vmul.f32 %v4664_v37, %v5885_v14  ;;  %v2092_v53 = vsel %vm906_vm4, %v2090_v26, %v5779_v51  ;;  %v2336_v44 = vsel %vm1151_vm5, %v2334_v4, %v2335_v60 }
 0x3c2   : > { %v941_v9 = vsel %vm906_vm4, %v5884_v23, %v940_v61  ;;  %v1313_v3 = vmul.f32 %v3765_v21, %v4915_v28  ;;  %v5886_v48 = vrot.slane %v5139_v40, 2  ;;  %v1498_v23 = vsel %vm906_vm4, %v1495_v1, %v1497_v8 }
 0x3c3   : > { %v1032_v24 = vadd.f32 %v941_v9, %v755_v10  ;;  %v2160_v57 = vadd.f32 %v2092_v53, %v1916_v49  ;;  %v1869_v26 = vmul.f32 %v3771_v25, %v5878_v33  ;;  %v1741_v31 = vrot.slane %v1632_v27, 2 }
 0x3c4   : > { %v1186_v61 = vsel %vm1151_vm5, %v5886_v48, %v1185_v19  ;;  %v831_v4 = vmul.f32 %v3761_v45, %v4909_v54  ;;  %v5344_v10 = vmul.f32 %v3761_v45, %v4915_v28  ;;  %v2053_v40 = vrot.slane %v1944_v62, 1 }
 0x3c5   : > { %v1277_v51 = vadd.f32 %v1186_v61, %v1032_v24  ;;  %v2404_v49 = vadd.f32 %v2336_v44, %v2160_v57  ;;  %v2297_v9 = vrot.slane %v2188_v30, 2  ;;  %v1076_v20 = vmul.f32 %v3763_v34, %v4909_v54 }
 0x3c6   : > { %v942_v1 = vrot.slane %v831_v4, 1  ;;  %v943_v8 = vrot.slane %v5344_v10, 1  ;;  %v5351_v27 = vmul.f32 %v3763_v34, %v4915_v28  ;;  %v756_v53 = vmul.f32 %v3759_v58, %v4909_v54 }
 0x3c7   : > { %v1345_v19 = vadd.f32 %v1313_v3, %v1277_v51  ;;  %2975 = vmatprep.mubr.msk.f32.mxu1 %vm252_vm0, %v2404_v49  ;;  %v1187_v24 = vrot.slane %v1076_v20, 2  ;;  %v1389_v62 = vmul.f32 %v3767_v36, %v5877_v56  ;;  %v5360_v30 = vmul.f32 %v3767_v36, %v5878_v33 }
 0x3c8   : > { %v944_v44 = vsel %vm906_vm4, %v942_v1, %v943_v8  ;;  %v1188_v3 = vrot.slane %v5351_v27, 2  ;;  %v1633_v57 = vmul.f32 %v3769_v2, %v5877_v56  ;;  %v1742_v54 = vsel %vm1151_vm5, %v1739_v22, %v1741_v31  ;;  %v5887_v31 = vld [vmem:[#allocation3_spill] sm:$0xff] }
 0x3c9   : > { %v1589_v51 = vadd.f32 %v1498_v23, %v1345_v19  ;;  %v1033_v48 = vadd.f32 %v944_v44, %v756_v53  ;;  %v1499_v61 = vrot.slane %v1389_v62, 1  ;;  %v5373_v4 = vmul.f32 %v3769_v2, %v5878_v33 }
 0x3ca   : > { %v1189_v49 = vsel %vm1151_vm5, %v1187_v24, %v1188_v3  ;;  %v1500_v20 = vrot.slane %v5360_v30, 1  ;;  %v1743_v19 = vrot.slane %v1633_v57, 2  ;;  %v1314_v38 = vmul.f32 %v3765_v21, %v5877_v56 }
 0x3cb   : > { %v1833_v23 = vadd.f32 %v1742_v54, %v1589_v51  ;;  %v1278_v1 = vadd.f32 %v1189_v49, %v1033_v48  ;;  %v1744_v22 = vrot.slane %v5373_v4, 2  ;;  %v1945_v53 = vmul.f32 %v3773_v41, %v5887_v31 }
 0x3cc   : > { %v5386_v51 = vmul.f32 %v3773_v41, %v3785_v39  ;;  %v2189_v24 = vmul.f32 %v4664_v37, %v5887_v31  ;;  %v5392_v44 = vmul.f32 %v4664_v37, %v3785_v39  ;;  %v2054_v56 = vsel %vm906_vm4, %v2051_v43, %v2053_v40 }
 0x3cd   : > { %v1901_v62 = vadd.f32 %v1869_v26, %v1833_v23  ;;  %v2298_v57 = vsel %vm1151_vm5, %v2295_v59, %v2297_v9  ;;  %v1346_v26 = vadd.f32 %v1314_v38, %v1278_v1  ;;  %v1870_v54 = vmul.f32 %v3771_v25, %v5887_v31 }
 0x3ce   : > { %v1501_v23 = vsel %vm906_vm4, %v1499_v61, %v1500_v20  ;;  %v1745_v37 = vsel %vm1151_vm5, %v1743_v19, %v1744_v22  ;;  %v2055_v29 = vrot.slane %v1945_v53, 1  ;;  %v2056_v43 = vrot.slane %v5386_v51, 1 }
 0x3cf   : > { %v2145_v48 = vadd.f32 %v2054_v56, %v1901_v62  ;;  %v1590_v49 = vadd.f32 %v1501_v23, %v1346_v26  ;;  %v854_v15 = vmul.f32 %v3761_v45, %v5867_v55  ;;  %v1099_v59 = vmul.f32 %v3763_v34, %v5867_v55  ;;  %v5433_v23 = vld [vmem:[%s5694_s1 + $0x8] ss:$0 sm:$0xff] }
 0x3d0   : > { %v2299_v9 = vrot.slane %v2189_v24, 2  ;;  %v5781_v1 = vrot.slane %v5392_v44, 2  ;;  %v1412_v61 = vmul.f32 %v3767_v36, %v5879_v63  ;;  %v1656_v53 = vmul.f32 %v3769_v2, %v5879_v63 }
 0x3d1   : > { %v2389_v40 = vadd.f32 %v2298_v57, %v2145_v48  ;;  %v1834_v38 = vadd.f32 %v1745_v37, %v1590_v49  ;;  %v980_v31 = vrot.slane %v854_v15, 1  ;;  %v1225_v19 = vrot.slane %v1099_v59, 2 }
 0x3d2   : > { %v5420_v62 = vmul.f32 %v3767_v36, %v5880_v42  ;;  %v771_v55 = vmul.f32 %v3759_v58, %v5860_v18  ;;  %v1537_v24 = vrot.slane %v1412_v61, 1  ;;  %v5888_v57 = vrot.slane %v5234_v16, 1 }
 0x3d3   : > { %2952 = vmatmul.mubr.msk.f32.gmra.mrb[12].mxu0 %vm252_vm0, %v2389_v40  ;;  %v1902_v56 = vadd.f32 %v1870_v54, %v1834_v38  ;;  %v1329_v48 = vmul.f32 %v3765_v21, %v5871_v35  ;;  %v2212_v37 = vmul.f32 %v5433_v23, %v5880_v42  ;;  %v2057_v18 = vsel %vm906_vm4, %v2055_v29, %v2056_v43 }
 0x3d4   : > { %v981_v26 = vsel %vm906_vm4, %v5888_v57, %v980_v31  ;;  %v2301_v16 = vsel %vm1151_vm5, %v2299_v9, %v5781_v1  ;;  %v2093_v49 = vrot.slane %v5272_v32, 1  ;;  %v5889_v59 = vrot.slane %v5244_v5, 2 }
 0x3d5   : > { %v1048_v54 = vadd.f32 %v981_v26, %v771_v55  ;;  %v2146_v15 = vadd.f32 %v2057_v18, %v1902_v56  ;;  %v1781_v61 = vrot.slane %v1656_v53, 2  ;;  %v855_v38 = vmul.f32 %v3761_v45, %v5870_v7 }
 0x3d6   : > { %v1226_v40 = vsel %vm1151_vm5, %v5889_v59, %v1225_v19  ;;  %v5890_v57 = vrot.slane %v5254_v6, 1  ;;  %v5454_v9 = vmul.f32 %v3761_v45, %v5871_v35  ;;  %v1100_v32 = vmul.f32 %v3763_v34, %v5870_v7 }
 0x3d7   : > { %v1293_v31 = vadd.f32 %v1226_v40, %v1048_v54  ;;  %v2390_v55 = vadd.f32 %v2301_v16, %v2146_v15  ;;  %v2337_v5 = vrot.slane %v2212_v37, 2  ;;  %v982_v56 = vrot.slane %v855_v38, 1 }
 0x3d8   : > { %v1538_v29 = vsel %vm906_vm4, %v5890_v57, %v1537_v24  ;;  %v5460_v19 = vmul.f32 %v3763_v34, %v5871_v35  ;;  %v983_v26 = vrot.slane %v5454_v9, 1  ;;  %v1227_v6 = vrot.slane %v1100_v32, 2 }
 0x3d9   : > { %v1361_v53 = vadd.f32 %v1329_v48, %v1293_v31  ;;  %v1413_v24 = vmul.f32 %v3767_v36, %v5881_v17  ;;  %2954 = vmatprep.mubr.msk.f32.mxu0 %vm252_vm0, %v2390_v55  ;;  %v772_v18 = vmul.f32 %v3759_v58, %v5870_v7  ;;  %v5471_v37 = vmul.f32 %v3767_v36, %v5882_v46 }
 0x3da   : > { %v1228_v16 = vrot.slane %v5460_v19, 2  ;;  %v1657_v48 = vmul.f32 %v3769_v2, %v5881_v17  ;;  %v1885_v15 = vmul.f32 %v3771_v25, %v5882_v46  ;;  %v984_v59 = vsel %vm906_vm4, %v982_v56, %v983_v26 }
 0x3db   : > { %v1605_v54 = vadd.f32 %v1538_v29, %v1361_v53  ;;  %v5482_v7 = vmul.f32 %v3769_v2, %v5882_v46  ;;  %v5891_v40 = vrot.slane %v5261_v50, 2  ;;  %v1049_v31 = vadd.f32 %v984_v59, %v772_v18 }
 0x3dc   : > { %v1539_v57 = vrot.slane %v1413_v24, 1  ;;  %v1540_v32 = vrot.slane %v5471_v37, 1  ;;  %v5892_v55 = vrot.slane %v5278_v11, 1  ;;  %v2338_v56 = vsel %vm1151_vm5, %v2335_v60, %v2337_v5 }
 0x3dd   : > { %v1782_v38 = vsel %vm1151_vm5, %v5891_v40, %v1781_v61  ;;  %v1229_v1 = vsel %vm1151_vm5, %v1227_v6, %v1228_v16  ;;  %v1330_v61 = vmul.f32 %v3765_v21, %v5881_v17  ;;  %v1783_v24 = vrot.slane %v1657_v48, 2 }
 0x3de   : > { %v1849_v29 = vadd.f32 %v1782_v38, %v1605_v54  ;;  %v2094_v53 = vsel %vm906_vm4, %v5892_v55, %v2093_v49  ;;  %v1294_v50 = vadd.f32 %v1229_v1, %v1049_v31  ;;  %v833_v18 = vmul.f32 %v3761_v45, %v5082_v52  ;;  %v5893_v49 = vld [vmem:[#allocation20_spill] sm:$0xff] }
 0x3df   : > { %v1784_v11 = vrot.slane %v5482_v7, 2  ;;  %v5504_v13 = vmul.f32 %v3773_v41, %v5893_v49  ;;  %v5508_v60 = vmul.f32 %v5433_v23, %v5893_v49  ;;  %v1541_v17 = vsel %vm906_vm4, %v1539_v57, %v1540_v32 }
 0x3e0   : > { %v1917_v54 = vadd.f32 %v1885_v15, %v1849_v29  ;;  %v1362_v5 = vadd.f32 %v1330_v61, %v1294_v50  ;;  %v945_v1 = vrot.slane %v833_v18, 1  ;;  %v1078_v6 = vmul.f32 %v3763_v34, %v5082_v52 }
 0x3e1   : > { %v757_v15 = vmul.f32 %v3759_v58, %v4915_v28  ;;  %v1391_v59 = vmul.f32 %v3767_v36, %v5885_v14  ;;  %v1635_v40 = vmul.f32 %v3769_v2, %v5885_v14  ;;  %v1947_v29 = vmul.f32 %v3773_v41, %v4085_v47 }
 0x3e2   : > { %v2161_v48 = vadd.f32 %v2094_v53, %v1917_v54  ;;  %v1606_v38 = vadd.f32 %v1541_v17, %v1362_v5  ;;  %v946_v31 = vsel %vm906_vm4, %v943_v8, %v945_v1  ;;  %v1190_v57 = vrot.slane %v1078_v6, 2  ;;  %v2959_v53 = vpop.f32.mrb[0].mxu1 }
 0x3e3   : > { %v1785_v28 = vsel %vm1151_vm5, %v1783_v24, %v1784_v11  ;;  %v1034_v55 = vadd.f32 %v946_v31, %v757_v15  ;;  %v1502_v36 = vrot.slane %v1391_v59, 1  ;;  %v1886_v14 = vmul.f32 %v3771_v25, %v5893_v49  ;;  %v2665_v61 = vpop.f32.mrb[1].mxu1 }
 0x3e4   : > { %v2405_v52 = vadd.f32 %v2338_v56, %v2161_v48  ;;  %v1850_v50 = vadd.f32 %v1785_v28, %v1606_v38  ;;  %v1191_v10 = vsel %vm1151_vm5, %v1188_v3, %v1190_v57  ;;  %v1746_v8 = vrot.slane %v1635_v40, 2 }
 0x3e5   : > { %v1659_v41 = vmul.f32 %v3769_v2, %v5880_v42  ;;  %v2095_v56 = vrot.slane %v5504_v13, 1  ;;  %v1279_v24 = vadd.f32 %v1191_v10, %v1034_v55  ;;  %v1315_v18 = vmul.f32 %v3765_v21, %v5878_v33  ;;  %v5547_v2 = vld [vmem:[%s5696_s3] ss:$0 sm:$0xff] }
 0x3e6   : > { %2976 = vmatmul.mubr.msk.f32.gmra.mrb[12].mxu1 %vm252_vm0, %v2405_v52  ;;  %v1918_v54 = vadd.f32 %v1886_v14, %v1850_v50  ;;  %v2339_v49 = vrot.slane %v5508_v60, 2  ;;  %v2058_v27 = vrot.slane %v1947_v29, 1  ;;  %v857_v3 = vmul.f32 %v3761_v45, %v5879_v63 }
 0x3e7   : > { %v1347_v42 = vadd.f32 %v1315_v18, %v1279_v24  ;;  %v1503_v13 = vsel %vm906_vm4, %v1500_v20, %v1502_v36  ;;  %v2191_v33 = vmul.f32 %v5433_v23, %v4085_v47  ;;  %v1102_v60 = vmul.f32 %v3763_v34, %v5879_v63 }
 0x3e8   : > { %v2162_v5 = vadd.f32 %v2095_v56, %v1918_v54  ;;  %v1747_v45 = vsel %vm1151_vm5, %v1744_v22, %v1746_v8  ;;  %v773_v17 = vmul.f32 %v3759_v58, %v5871_v35  ;;  %v985_v1 = vrot.slane %v857_v3, 1 }
 0x3e9   : > { %v1591_v30 = vadd.f32 %v1503_v13, %v1347_v42  ;;  %v1230_v47 = vrot.slane %v1102_v60, 2  ;;  %v2591_v34 = vadd.f32 %v5312_v12, %v5547_v2  ;;  %v2586_v35 = vadd.f32 %v5547_v2, %v5322_v0 }
 0x3ea   : > { %v2406_v63 = vadd.f32 %v2339_v49, %v2162_v5  ;;  %v986_v58 = vsel %vm906_vm4, %v983_v26, %v985_v1  ;;  %v2671_v4 = vadd.f32 %v2959_v53, %v5547_v2  ;;  %v1871_v22 = vmul.f32 %v3771_v25, %v3785_v39 }
 0x3eb   : > { %v1835_v20 = vadd.f32 %v1747_v45, %v1591_v30  ;;  %v1050_v23 = vadd.f32 %v986_v58, %v773_v17  ;;  %2746 = vst.msk [vmem:[%s5564_s5 + $0x8] sm:$0xff] %vm2744_vm6, %v2591_v34  ;;  %v2666_v12 = vadd.f32 %v5547_v2, %v2665_v61  ;;  %v1542_v6 = vrot.slane %v5420_v62, 1  ;;  %2745 = vst.msk [vmem:[%s5564_s5] sm:$0xff] %vm2744_vm6, %v2586_v35 }
 0x3ec   : > { %2978 = vmatprep.mubr.msk.f32.mxu1 %vm252_vm0, %v2406_v63  ;;  %v2302_v9 = vrot.slane %v2191_v33, 2  ;;  %v1231_v0 = vsel %vm1151_vm5, %v1228_v16, %v1230_v47  ;;  %2762 = vst.msk [vmem:[%s5564_s5 + $0x88] sm:$0xff] %vm2744_vm6, %v2671_v4  ;;  %v1331_v39 = vmul.f32 %v3765_v21, %v5882_v46  ;;  %v1786_v48 = vrot.slane %v1659_v41, 2  ;;  %v2938_v38 = vpop.f32.mrb[2].mxu0 }
 0x3ed   : > { %v1903_v26 = vadd.f32 %v1871_v22, %v1835_v20  ;;  %v1295_v25 = vadd.f32 %v1231_v0, %v1050_v23  ;;  %2761 = vst.msk [vmem:[%s5564_s5 + $0x80] sm:$0xff] %vm2744_vm6, %v2666_v12  ;;  %v2059_v62 = vsel %vm906_vm4, %v2056_v43, %v2058_v27  ;;  %v5894_v15 = vrot.slane %v5392_v44, 2  ;;  %v2595_v57 = vpop.f32.mrb[3].mxu0 }
 0x3ee   : > { %v1543_v40 = vsel %vm906_vm4, %v1540_v32, %v1542_v6  ;;  %v1787_v51 = vsel %vm1151_vm5, %v1784_v11, %v1786_v48  ;;  %v2601_v44 = vadd.f32 %v2938_v38, %v5547_v2  ;;  %v2596_v37 = vadd.f32 %v5547_v2, %v2595_v57 }
 0x3ef   : > { %v2147_v19 = vadd.f32 %v2059_v62, %v1903_v26  ;;  %v1363_v16 = vadd.f32 %v1331_v39, %v1295_v25  ;;  %v2303_v59 = vsel %vm1151_vm5, %v5894_v15, %v2302_v9 }
 0x3f0   : > { %2748 = vst.msk [vmem:[%s5564_s5 + $0x18] sm:$0xff] %vm2744_vm6, %v2601_v44  ;;  %2747 = vst.msk [vmem:[%s5564_s5 + $0x10] sm:$0xff] %vm2744_vm6, %v2596_v37 }
 0x3f1   : > { %v2391_v21 = vadd.f32 %v2303_v59, %v2147_v19  ;;  %v1607_v46 = vadd.f32 %v1543_v40, %v1363_v16 }
 0x3f3   : > { %2955 = vmatmul.mubr.msk.f32.gmra.mrb[14].mxu0 %vm252_vm0, %v2391_v21  ;;  %v1851_v43 = vadd.f32 %v1787_v51, %v1607_v46 }
 0x3f5   : > { %v1919_v31 = vadd.f32 %v1886_v14, %v1851_v43 }
 0x3f7   : > { %v2163_v32 = vadd.f32 %v2095_v56, %v1919_v31 }
 0x3f9   : > { %v2407_v7 = vadd.f32 %v2339_v49, %v2163_v32 }
 0x3fb   : > { %2979 = vmatmul.mubr.msk.f32.gmra.mrb[14].mxu1 %vm252_vm0, %v2407_v7 }
 0x400   : > { %v2962_v11 = vpop.f32.mrb[2].mxu1 }
 0x401   : > { %v2681_v29 = vadd.f32 %v2962_v11, %v5547_v2  ;;  %v2675_v52 = vpop.f32.mrb[3].mxu1 }
 0x402   : > { %v2676_v28 = vadd.f32 %v5547_v2, %v2675_v52 }
 0x403   : > { %2764 = vst.msk [vmem:[%s5564_s5 + $0x98] sm:$0xff] %vm2744_vm6, %v2681_v29 }
 0x404   : > { %2763 = vst.msk [vmem:[%s5564_s5 + $0x90] sm:$0xff] %vm2744_vm6, %v2676_v28 }
 0x413   : > { %v2941_v55 = vpop.f32.mrb[4].mxu0 }
 0x414   : > { %v2611_v36 = vadd.f32 %v2941_v55, %v5547_v2  ;;  %v2605_v53 = vpop.f32.mrb[5].mxu0 }
 0x415   : > { %v2606_v50 = vadd.f32 %v5547_v2, %v2605_v53 }
 0x416   : > { %2750 = vst.msk [vmem:[%s5564_s5 + $0x28] sm:$0xff] %vm2744_vm6, %v2611_v36 }
 0x417   : > { %2749 = vst.msk [vmem:[%s5564_s5 + $0x20] sm:$0xff] %vm2744_vm6, %v2606_v50 }
 0x424   : > { %v2965_v14 = vpop.f32.mrb[4].mxu1 }
 0x425   : > { %v2691_v10 = vadd.f32 %v2965_v14, %v5547_v2  ;;  %v2685_v8 = vpop.f32.mrb[5].mxu1 }
 0x426   : > { %v2686_v61 = vadd.f32 %v5547_v2, %v2685_v8 }
 0x427   : > { %2766 = vst.msk [vmem:[%s5564_s5 + $0xa8] sm:$0xff] %vm2744_vm6, %v2691_v10 }
 0x428   : > { %2765 = vst.msk [vmem:[%s5564_s5 + $0xa0] sm:$0xff] %vm2744_vm6, %v2686_v61 }
 0x438   : > { %v2944_v41 = vpop.f32.mrb[6].mxu0 }
 0x439   : > { %v2621_v56 = vadd.f32 %v2944_v41, %v5547_v2  ;;  %v2615_v24 = vpop.f32.mrb[7].mxu0 }
 0x43a   : > { %v2616_v18 = vadd.f32 %v5547_v2, %v2615_v24 }
 0x43b   : > { %2752 = vst.msk [vmem:[%s5564_s5 + $0x38] sm:$0xff] %vm2744_vm6, %v2621_v56 }
 0x43c   : > { %2751 = vst.msk [vmem:[%s5564_s5 + $0x30] sm:$0xff] %vm2744_vm6, %v2616_v18 }
 0x44a   : > { %v2968_v54 = vpop.f32.mrb[6].mxu1 }
 0x44b   : > { %v2701_v49 = vadd.f32 %v2968_v54, %v5547_v2  ;;  %v2695_v27 = vpop.f32.mrb[7].mxu1 }
 0x44c   : > { %v2696_v3 = vadd.f32 %v5547_v2, %v2695_v27 }
 0x44d   : > { %2768 = vst.msk [vmem:[%s5564_s5 + $0xb8] sm:$0xff] %vm2744_vm6, %v2701_v49 }
 0x44e   : > { %2767 = vst.msk [vmem:[%s5564_s5 + $0xb0] sm:$0xff] %vm2744_vm6, %v2696_v3 }
 0x45c   : > { %v2947_v42 = vpop.f32.mrb[8].mxu0 }
 0x45d   : > { %v2631_v13 = vadd.f32 %v2947_v42, %v5547_v2  ;;  %v2625_v33 = vpop.f32.mrb[9].mxu0 }
 0x45e   : > { %v2626_v60 = vadd.f32 %v5547_v2, %v2625_v33 }
 0x45f   : > { %2754 = vst.msk [vmem:[%s5564_s5 + $0x48] sm:$0xff] %vm2744_vm6, %v2631_v13 }
 0x460   : > { %2753 = vst.msk [vmem:[%s5564_s5 + $0x40] sm:$0xff] %vm2744_vm6, %v2626_v60 }
 0x46f   : > { %v2971_v5 = vpop.f32.mrb[8].mxu1 }
 0x470   : > { %v2711_v45 = vadd.f32 %v2971_v5, %v5547_v2  ;;  %v2705_v17 = vpop.f32.mrb[9].mxu1 }
 0x471   : > { %v2706_v1 = vadd.f32 %v5547_v2, %v2705_v17 }
 0x472   : > { %2770 = vst.msk [vmem:[%s5564_s5 + $0xc8] sm:$0xff] %vm2744_vm6, %v2711_v45 }
 0x473   : > { %2769 = vst.msk [vmem:[%s5564_s5 + $0xc0] sm:$0xff] %vm2744_vm6, %v2706_v1 }
 0x482   : > { %v2950_v30 = vpop.f32.mrb[10].mxu0 }
 0x483   : > { %v2641_v47 = vadd.f32 %v2950_v30, %v5547_v2  ;;  %v2635_v34 = vpop.f32.mrb[11].mxu0 }
 0x484   : > { %v2636_v63 = vadd.f32 %v5547_v2, %v2635_v34 }
 0x485   : > { %2756 = vst.msk [vmem:[%s5564_s5 + $0x58] sm:$0xff] %vm2744_vm6, %v2641_v47 }
 0x486   : > { %2755 = vst.msk [vmem:[%s5564_s5 + $0x50] sm:$0xff] %vm2744_vm6, %v2636_v63 }
 0x494   : > { %v2974_v58 = vpop.f32.mrb[10].mxu1 }
 0x495   : > { %v2721_v35 = vadd.f32 %v2974_v58, %v5547_v2  ;;  %v2715_v4 = vpop.f32.mrb[11].mxu1 }
 0x496   : > { %v2716_v20 = vadd.f32 %v5547_v2, %v2715_v4 }
 0x497   : > { %2772 = vst.msk [vmem:[%s5564_s5 + $0xd8] sm:$0xff] %vm2744_vm6, %v2721_v35 }
 0x498   : > { %2771 = vst.msk [vmem:[%s5564_s5 + $0xd0] sm:$0xff] %vm2744_vm6, %v2716_v20 }
 0x4a6   : > { %v2953_v22 = vpop.f32.mrb[12].mxu0 }
 0x4a7   : > { %v2651_v23 = vadd.f32 %v2953_v22, %v5547_v2  ;;  %v2645_v12 = vpop.f32.mrb[13].mxu0 }
 0x4a8   : > { %v2646_v6 = vadd.f32 %v5547_v2, %v2645_v12 }
 0x4a9   : > { %2758 = vst.msk [vmem:[%s5564_s5 + $0x68] sm:$0xff] %vm2744_vm6, %v2651_v23 }
 0x4aa   : > { %2757 = vst.msk [vmem:[%s5564_s5 + $0x60] sm:$0xff] %vm2744_vm6, %v2646_v6 }
 0x4b9   : > { %v2977_v9 = vpop.f32.mrb[12].mxu1 }
 0x4ba   : > { %v2731_v0 = vadd.f32 %v2977_v9, %v5547_v2  ;;  %v2725_v26 = vpop.f32.mrb[13].mxu1 }
 0x4bb   : > { %v2726_v25 = vadd.f32 %v5547_v2, %v2725_v26 }
 0x4bc   : > { %2774 = vst.msk [vmem:[%s5564_s5 + $0xe8] sm:$0xff] %vm2744_vm6, %v2731_v0 }
 0x4bd   : > { %2773 = vst.msk [vmem:[%s5564_s5 + $0xe0] sm:$0xff] %vm2744_vm6, %v2726_v25 }
 0x4c6   : > { %v2956_v39 = vpop.f32.mrb[14].mxu0 }
 0x4c7   : > { %v2661_v48 = vadd.f32 %v2956_v39, %v5547_v2  ;;  %v2655_v62 = vpop.f32.mrb[15].mxu0 }
 0x4c8   : > { %v2656_v19 = vadd.f32 %v5547_v2, %v2655_v62 }
 0x4c9   : > { %2760 = vst.msk [vmem:[%s5564_s5 + $0x78] sm:$0xff] %vm2744_vm6, %v2661_v48 }
 0x4ca   : > { %2759 = vst.msk [vmem:[%s5564_s5 + $0x70] sm:$0xff] %vm2744_vm6, %v2656_v19 }
 0x4ce   : > { %v2980_v16 = vpop.f32.mrb[14].mxu1 }
 0x4cf   : > { %v2741_v15 = vadd.f32 %v2980_v16, %v5547_v2  ;;  %v2735_v59 = vpop.f32.mrb[15].mxu1 }
 0x4d0   : > { %v2736_v40 = vadd.f32 %v5547_v2, %v2735_v59 }
 0x4d1   : > { %2776 = vst.msk [vmem:[%s5564_s5 + $0xf8] sm:$0xff] %vm2744_vm6, %v2741_v15 }
 0x4d2   : > { %2775 = vst.msk [vmem:[%s5564_s5 + $0xf0] sm:$0xff] %vm2744_vm6, %v2736_v40 }
 0x4d3 PF: > { %s14_s15 = sadd.s32 1, %s3030_s15  }
 0x4d4   : > { %p11_p4 = scmp.ge.s32.totalorder %s14_s15, 4  }
 0x4d6   :  { %13 = sbr.rel (!%p11_p4) target bundleno = 1 (0x1), region = 66 }

</bundles_post_ra>
